<compile_context>
chip_gen: v7x
topology: tpu7x:2x2x1
jax: 0.10.0
libtpu: 0.0.40
codegen_flags: <defaults>
</compile_context>

<pallas_src>
import functools

import jax
import jax.numpy as jnp
from jax.experimental import pallas as pl
from jax.experimental.pallas import tpu as pltpu


def _make_divisible(v, divisor, min_value=None):
    if min_value is None:
        min_value = divisor
    new_v = max(min_value, int(v + divisor / 2) // divisor * divisor)
    if new_v < 0.9 * v:
        new_v += divisor
    return new_v


def mbconv_kernel(x_ref, w1_ref, b1_ref, wm_ref, b2_ref,
                  wf1_ref, bf1_ref, wf2_ref, bf2_ref, w3_ref, b3_ref,
                  o_ref, *, H, W, B_TILE):
    """B_TILE images per grid step, channels-first layout (C, B_TILE*H*W).

    Channels sit on sublanes; (image, pixel) flattened on lanes, so every
    vector load/store is unmasked and the projected output stays in NCHW order.
    """
    HW = H * W
    LHW = B_TILE * HW
    Chid = w1_ref.shape[0]

    x = x_ref[...]                                                  # (Cin, LHW) f32

    def _sigmoid(v):
        # exp + approximate reciprocal both route to the EUP slot (VALU has no slack).
        return pl.reciprocal(1.0 + jnp.exp(-v), approx=True)

    # ---- 1x1 expand conv (BN scale folded into w1) + bias + SiLU ----------
    h = jnp.dot(w1_ref[...], x, preferred_element_type=jnp.float32)  # (Chid, LHW)
    h = h + b1_ref[...]
    h = h * _sigmoid(h)

    # ---- 3x3 depthwise conv, stride 1, pad 1 -------------------------------
    # 9 lane rolls; edge masks (incl. cross-image wraparound kill) are already
    # folded into the per-tap weights wm_ref[k]  -> one mul + one add per tap.
    acc = jnp.zeros((Chid, LHW), jnp.float32)
    for k in range(9):
        dy, dx = k // 3 - 1, k % 3 - 1
        d = dy * W + dx
        tap = h if d == 0 else pltpu.roll(h, (-d) % LHW, 1)
        acc = acc + tap * wm_ref[k]
    dcv = acc + b2_ref[...]
    dcv = dcv * _sigmoid(dcv)

    # ---- Squeeze-and-Excitation (per image; VPU / XLU only) ----------------
    # Static lane slices at multiples of HW=256 are (8,128)-tile aligned.
    gated_parts = []
    for b in range(B_TILE):
        dcv_b = dcv[:, b * HW:(b + 1) * HW]                                     # (Chid, HW)
        pooled = jnp.sum(dcv_b, axis=1, keepdims=True) * (1.0 / HW)             # (Chid, 1)
        y1 = jnp.sum(pooled * wf1_ref[...], axis=0, keepdims=True) + bf1_ref[...]  # (1, red)
        y1 = y1 * _sigmoid(y1)
        y2 = jnp.sum(y1 * wf2_ref[...], axis=1, keepdims=True) + bf2_ref[...]      # (Chid, 1)
        gated_parts.append(dcv_b * _sigmoid(y2))
    gated = gated_parts[0] if B_TILE == 1 else jnp.concatenate(gated_parts, axis=1)

    # ---- 1x1 project conv (BN scale folded) + bias + identity residual -----
    out = jnp.dot(w3_ref[...], gated, preferred_element_type=jnp.float32)       # (Cout, LHW)
    o_ref[...] = out + b3_ref[...] + x


def _const_spec(shape):
    nd = len(shape)
    return pl.BlockSpec(shape, lambda g, nd=nd: (0,) * nd)


def mbconv_forward(x_nchw, p, *, b_tile=None):
    """x_nchw: (B, Cin, H, W) float32. Returns (B, Cout, H, W)."""
    B, Cin, H, W = x_nchw.shape
    Chid = p["w1"].shape[1]
    Cout = p["w3"].shape[1]
    red = p["wf1"].shape[1]
    assert Cin == Cout, "identity branch requires inp == oup"
    HW = H * W

    if b_tile is None:
        # Collapse the grid as much as possible to amortize per-step overhead
        # (best on v5e/v6e, 1 TensorCore).  On v7x (2 TCs) prefer b_tile = B//2
        # so two "parallel" grid steps shard across the cores.
        cap = 8                      # keeps the pre-masked DW constant small
        b_tile = 1
        for t in range(1, min(B, cap) + 1):
            if B % t == 0:
                b_tile = t
    assert B % b_tile == 0
    G = B // b_tile
    LHW = b_tile * HW

    # Channels on sublanes; (image, pixel) flattened on lanes.  The small
    # (B, C) transpose happens once in XLA outside the kernel.
    x2 = jnp.transpose(x_nchw, (1, 0, 2, 3)).reshape(Cin, B * HW).astype(jnp.float32)

    # Fold BN scales into the conv weights; keep only the biases.
    s1 = p["s1"].reshape(Chid, 1)
    s2 = p["s2"].reshape(Chid, 1)
    s3 = p["s3"].reshape(Cout, 1)
    w1t = (p["w1"].T * s1).astype(jnp.float32)                  # (Chid, Cin)
    w3t = (p["w3"].T * s3).astype(jnp.float32)                  # (Cout, Chid)
    b1 = p["b1"].reshape(Chid, 1).astype(jnp.float32)
    b2 = p["b2"].reshape(Chid, 1).astype(jnp.float32)
    b3 = p["b3"].reshape(Cout, 1).astype(jnp.float32)
    wf1 = p["wf1"].astype(jnp.float32)                          # (Chid, red)
    bf1 = p["bf1"].reshape(1, red).astype(jnp.float32)          # (1, red)
    wf2t = p["wf2"].T.astype(jnp.float32)                       # (Chid, red)
    bf2 = p["bf2"].reshape(Chid, 1).astype(jnp.float32)

    # Pre-masked per-tap depthwise weights: zero-pad edge masks (which also kill
    # the cross-image wraparound introduced by rolling over B_TILE*HW lanes)
    # folded into the BN-scaled DW weights.  Shape (9, Chid, LHW), ~0.6 MB here.
    wdw = (p["wdw"].T * s2).astype(jnp.float32)                 # (Chid, 9)
    lane = jnp.arange(LHW)
    col = lane % W
    row = (lane // W) % H
    wm_taps = []
    for dy in (-1, 0, 1):
        for dx in (-1, 0, 1):
            k = (dy + 1) * 3 + (dx + 1)
            m = jnp.ones((LHW,), jnp.float32)
            if dy == -1:
                m = m * (row >= 1)
            elif dy == 1:
                m = m * (row <= H - 2)
            if dx == -1:
                m = m * (col >= 1)
            elif dx == 1:
                m = m * (col <= W - 2)
            wm_taps.append(wdw[:, k][:, None] * m[None, :])
    wm = jnp.stack(wm_taps, axis=0).astype(jnp.float32)         # (9, Chid, LHW)

    params = [w1t, b1, wm, b2, wf1, bf1, wf2t, bf2, w3t, b3]

    # Advisory cost estimate so XLA schedules well around this tiny custom call.
    flops = int(B * HW * (2 * Cin * Chid + 18 * Chid + 2 * Chid * Cout + 3 * Chid))
    transcendentals = int(B * (4 * HW * Chid + 4 * Chid + 2 * red))
    bytes_accessed = int(4 * (x2.size + B * Cout * HW + sum(w.size for w in params)))

    kernel = functools.partial(mbconv_kernel, H=H, W=W, B_TILE=b_tile)

    out = pl.pallas_call(
        kernel,
        out_shape=jax.ShapeDtypeStruct((Cout, B * HW), jnp.float32),
        grid_spec=pltpu.PrefetchScalarGridSpec(
            num_scalar_prefetch=0,
            grid=(G,),
            in_specs=[pl.BlockSpec((Cin, LHW), lambda g: (0, g))]
                     + [_const_spec(w.shape) for w in params],
            out_specs=pl.BlockSpec((Cout, LHW), lambda g: (0, g)),
        ),
        compiler_params=pltpu.CompilerParams(
            dimension_semantics=("parallel",)),
        cost_estimate=pl.CostEstimate(
            flops=flops, transcendentals=transcendentals,
            bytes_accessed=bytes_accessed),
    )(x2, *params)

    # (Cout, B*HW) -> (B, Cout, H, W); tiny transpose handled by XLA.
    return jnp.transpose(out.reshape(Cout, B, H, W), (1, 0, 2, 3))


def mbconv_reference(x_nchw, p):
    """Pure-JAX reference (NHWC internally), for validation."""
    Chid = p["w1"].shape[1]
    x = jnp.transpose(x_nchw, (0, 2, 3, 1)).astype(jnp.float32)
    h = jnp.einsum("bhwc,cd->bhwd", x, p["w1"]) * p["s1"] + p["b1"]
    h = h * jax.nn.sigmoid(h)
    dw = jax.lax.conv_general_dilated(
        h, p["wdw"].reshape(3, 3, 1, Chid),
        window_strides=(1, 1), padding=((1, 1), (1, 1)),
        dimension_numbers=("NHWC", "HWIO", "NHWC"),
        feature_group_count=Chid)
    d = dw * p["s2"] + p["b2"]
    d = d * jax.nn.sigmoid(d)
    pooled = jnp.mean(d, axis=(1, 2))                      # (B, Chid)
    y = pooled @ p["wf1"] + p["bf1"]
    y = y * jax.nn.sigmoid(y)
    y = jax.nn.sigmoid(y @ p["wf2"] + p["bf2"])
    d = d * y[:, None, None, :]
    out = jnp.einsum("bhwc,cd->bhwd", d, p["w3"]) * p["s3"] + p["b3"]
    out = out + x
    return jnp.transpose(out, (0, 3, 1, 2))


def _fold_bn(gamma, beta, mean, var, eps=1e-5):
    scale = gamma / jnp.sqrt(var + eps)
    bias = beta - mean * scale
    return scale[None, :], bias[None, :]


def make_params(key, inp, oup, expand_ratio):
    hidden = round(inp * expand_ratio)
    red = _make_divisible(inp // 4, 8)
    ks = list(jax.random.split(key, 16))

    def bn(k, c):
        k1, k2, k3, k4 = jax.random.split(k, 4)
        gamma = jax.random.uniform(k1, (c,), minval=0.8, maxval=1.2)
        beta = 0.1 * jax.random.normal(k2, (c,))
        mean = 0.1 * jax.random.normal(k3, (c,))
        var = jax.random.uniform(k4, (c,), minval=0.5, maxval=1.5)
        return _fold_bn(gamma, beta, mean, var)

    s1, b1 = bn(ks[0], hidden)
    s2, b2 = bn(ks[1], hidden)
    s3, b3 = bn(ks[2], oup)
    p = {
        "w1": 0.2 * jax.random.normal(ks[3], (inp, hidden), jnp.float32),
        "s1": s1, "b1": b1,
        "wdw": 0.2 * jax.random.normal(ks[4], (9, hidden), jnp.float32),
        "s2": s2, "b2": b2,
        "wf1": 0.2 * jax.random.normal(ks[5], (hidden, red), jnp.float32),
        "bf1": 0.1 * jax.random.normal(ks[6], (1, red), jnp.float32),
        "wf2": 0.2 * jax.random.normal(ks[7], (red, hidden), jnp.float32),
        "bf2": 0.1 * jax.random.normal(ks[8], (1, hidden), jnp.float32),
        "w3": 0.2 * jax.random.normal(ks[9], (hidden, oup), jnp.float32),
        "s3": s3, "b3": b3,
    }
    return p


if __name__ == "__main__":
    B, INP, OUP, H, W = 2, 8, 8, 16, 16
    EXPAND = 4

    key = jax.random.PRNGKey(0)
    kx, kp = jax.random.split(key)
    x = jax.random.normal(kx, (B, INP, H, W), jnp.float32)   # NCHW like PyTorch
    params = make_params(kp, INP, OUP, EXPAND)

    out = mbconv_forward(x, params)
    out = jax.block_until_ready(out)

    ref = jax.block_until_ready(mbconv_reference(x, params))
    assert out.shape == (B, OUP, H, W)
    # Slightly wider tolerance: approx (EUP) reciprocal in the sigmoids drifts
    # ~1e-3 vs the exact logistic; real bugs would show O(0.1+) errors.
    assert jnp.allclose(out, ref, rtol=1e-2, atol=1e-2), float(
        jnp.max(jnp.abs(out - ref)))

    print("KERNEL_OK")
</pallas_src>

<mosaic_0001>
module attributes {stable_mosaic.version = 11 : i64} {
  func.func @mbconv_kernel(%arg0: i32, %arg1: memref<8x512xf32, #tpu.memory_space<vmem>>, %arg2: memref<32x8xf32, #tpu.memory_space<vmem>>, %arg3: memref<32x1xf32, #tpu.memory_space<vmem>>, %arg4: memref<9x32x512xf32, #tpu.memory_space<vmem>>, %arg5: memref<32x1xf32, #tpu.memory_space<vmem>>, %arg6: memref<32x8xf32, #tpu.memory_space<vmem>>, %arg7: memref<1x8xf32, #tpu.memory_space<vmem>>, %arg8: memref<32x8xf32, #tpu.memory_space<vmem>>, %arg9: memref<32x1xf32, #tpu.memory_space<vmem>>, %arg10: memref<8x32xf32, #tpu.memory_space<vmem>>, %arg11: memref<8x1xf32, #tpu.memory_space<vmem>>, %arg12: memref<8x512xf32, #tpu.memory_space<vmem>>) attributes {dimension_semantics = [#tpu.dimension_semantics<parallel>], iteration_bounds = array<i64: 1>, scalar_prefetch = 0 : i64, scratch_operands = 0 : i64, tpu.core_type = #tpu.core_type<tc>, window_params = [{transform_indices = @transform_0, window_bounds = array<i64: 8, 512>}, {pipeline_mode = #tpu.pipeline_mode<synchronous>, transform_indices = @transform_1, window_bounds = array<i64: 32, 8>}, {pipeline_mode = #tpu.pipeline_mode<synchronous>, transform_indices = @transform_2, window_bounds = array<i64: 32, 1>}, {pipeline_mode = #tpu.pipeline_mode<synchronous>, transform_indices = @transform_3, window_bounds = array<i64: 9, 32, 512>}, {pipeline_mode = #tpu.pipeline_mode<synchronous>, transform_indices = @transform_4, window_bounds = array<i64: 32, 1>}, {pipeline_mode = #tpu.pipeline_mode<synchronous>, transform_indices = @transform_5, window_bounds = array<i64: 32, 8>}, {pipeline_mode = #tpu.pipeline_mode<synchronous>, transform_indices = @transform_6, window_bounds = array<i64: 1, 8>}, {pipeline_mode = #tpu.pipeline_mode<synchronous>, transform_indices = @transform_7, window_bounds = array<i64: 32, 8>}, {pipeline_mode = #tpu.pipeline_mode<synchronous>, transform_indices = @transform_8, window_bounds = array<i64: 32, 1>}, {pipeline_mode = #tpu.pipeline_mode<synchronous>, transform_indices = @transform_9, window_bounds = array<i64: 8, 32>}, {pipeline_mode = #tpu.pipeline_mode<synchronous>, transform_indices = @transform_10, window_bounds = array<i64: 8, 1>}, {transform_indices = @transform_11, window_bounds = array<i64: 8, 512>}]} {
    %c0 = arith.constant 0 : index
    %c0_0 = arith.constant 0 : index
    %0 = vector.load %arg1[%c0, %c0_0] : memref<8x512xf32, #tpu.memory_space<vmem>>, vector<8x512xf32>
    %c0_1 = arith.constant 0 : index
    %c0_2 = arith.constant 0 : index
    %1 = vector.load %arg2[%c0_1, %c0_2] : memref<32x8xf32, #tpu.memory_space<vmem>>, vector<32x8xf32>
    %cst = arith.constant dense<0.000000e+00> : vector<32x512xf32>
    %2 = tpu.matmul %1, %0, %cst {dimension_numbers = #tpu.dot_dimension_numbers<[1], [0], [0], [1], [0, 0, 1, 1], [], []>} : vector<32x8xf32>, vector<8x512xf32>, vector<32x512xf32> -> vector<32x512xf32>
    %c0_3 = arith.constant 0 : index
    %c0_4 = arith.constant 0 : index
    %3 = vector.load %arg3[%c0_3, %c0_4] : memref<32x1xf32, #tpu.memory_space<vmem>>, vector<32x1xf32>
    %4 = vector.broadcast %3 : vector<32x1xf32> to vector<32x512xf32>
    %5 = arith.addf %2, %4 : vector<32x512xf32>
    %cst_5 = arith.constant 0.000000e+00 : f32
    %6 = vector.broadcast %cst_5 : f32 to vector<32x512xf32>
    %7 = arith.subf %6, %5 : vector<32x512xf32>
    %8 = math.exp %7 : vector<32x512xf32>
    %cst_6 = arith.constant 1.000000e+00 : f32
    %9 = vector.broadcast %cst_6 : f32 to vector<32x512xf32>
    %10 = arith.addf %9, %8 : vector<32x512xf32>
    %11 = tpu.reciprocal %10 {approx = true} : vector<32x512xf32> -> vector<32x512xf32>
    %12 = arith.mulf %5, %11 : vector<32x512xf32>
    %cst_7 = arith.constant 0.000000e+00 : f32
    %13 = vector.broadcast %cst_7 : f32 to vector<32x512xf32>
    %c17_i32 = arith.constant 17 : i32
    %14 = tpu.dynamic_rotate %12 by %c17_i32 dim 1 : vector<32x512xf32>, i32 -> vector<32x512xf32>
    %c0_8 = arith.constant 0 : index
    %c0_9 = arith.constant 0 : index
    %c0_10 = arith.constant 0 : index
    %15 = vector.load %arg4[%c0_8, %c0_9, %c0_10] : memref<9x32x512xf32, #tpu.memory_space<vmem>>, vector<1x32x512xf32>
    %16 = vector.shape_cast %15 : vector<1x32x512xf32> to vector<32x512xf32>
    %17 = arith.mulf %14, %16 : vector<32x512xf32>
    %18 = arith.addf %13, %17 : vector<32x512xf32>
    %c16_i32 = arith.constant 16 : i32
    %19 = tpu.dynamic_rotate %12 by %c16_i32 dim 1 : vector<32x512xf32>, i32 -> vector<32x512xf32>
    %c1 = arith.constant 1 : index
    %c0_11 = arith.constant 0 : index
    %c0_12 = arith.constant 0 : index
    %20 = vector.load %arg4[%c1, %c0_11, %c0_12] : memref<9x32x512xf32, #tpu.memory_space<vmem>>, vector<1x32x512xf32>
    %21 = vector.shape_cast %20 : vector<1x32x512xf32> to vector<32x512xf32>
    %22 = arith.mulf %19, %21 : vector<32x512xf32>
    %23 = arith.addf %18, %22 : vector<32x512xf32>
    %c15_i32 = arith.constant 15 : i32
    %24 = tpu.dynamic_rotate %12 by %c15_i32 dim 1 : vector<32x512xf32>, i32 -> vector<32x512xf32>
    %c2 = arith.constant 2 : index
    %c0_13 = arith.constant 0 : index
    %c0_14 = arith.constant 0 : index
    %25 = vector.load %arg4[%c2, %c0_13, %c0_14] : memref<9x32x512xf32, #tpu.memory_space<vmem>>, vector<1x32x512xf32>
    %26 = vector.shape_cast %25 : vector<1x32x512xf32> to vector<32x512xf32>
    %27 = arith.mulf %24, %26 : vector<32x512xf32>
    %28 = arith.addf %23, %27 : vector<32x512xf32>
    %c1_i32 = arith.constant 1 : i32
    %29 = tpu.dynamic_rotate %12 by %c1_i32 dim 1 : vector<32x512xf32>, i32 -> vector<32x512xf32>
    %c3 = arith.constant 3 : index
    %c0_15 = arith.constant 0 : index
    %c0_16 = arith.constant 0 : index
    %30 = vector.load %arg4[%c3, %c0_15, %c0_16] : memref<9x32x512xf32, #tpu.memory_space<vmem>>, vector<1x32x512xf32>
    %31 = vector.shape_cast %30 : vector<1x32x512xf32> to vector<32x512xf32>
    %32 = arith.mulf %29, %31 : vector<32x512xf32>
    %33 = arith.addf %28, %32 : vector<32x512xf32>
    %c4 = arith.constant 4 : index
    %c0_17 = arith.constant 0 : index
    %c0_18 = arith.constant 0 : index
    %34 = vector.load %arg4[%c4, %c0_17, %c0_18] : memref<9x32x512xf32, #tpu.memory_space<vmem>>, vector<1x32x512xf32>
    %35 = vector.shape_cast %34 : vector<1x32x512xf32> to vector<32x512xf32>
    %36 = arith.mulf %12, %35 : vector<32x512xf32>
    %37 = arith.addf %33, %36 : vector<32x512xf32>
    %c511_i32 = arith.constant 511 : i32
    %38 = tpu.dynamic_rotate %12 by %c511_i32 dim 1 : vector<32x512xf32>, i32 -> vector<32x512xf32>
    %c5 = arith.constant 5 : index
    %c0_19 = arith.constant 0 : index
    %c0_20 = arith.constant 0 : index
    %39 = vector.load %arg4[%c5, %c0_19, %c0_20] : memref<9x32x512xf32, #tpu.memory_space<vmem>>, vector<1x32x512xf32>
    %40 = vector.shape_cast %39 : vector<1x32x512xf32> to vector<32x512xf32>
    %41 = arith.mulf %38, %40 : vector<32x512xf32>
    %42 = arith.addf %37, %41 : vector<32x512xf32>
    %c497_i32 = arith.constant 497 : i32
    %43 = tpu.dynamic_rotate %12 by %c497_i32 dim 1 : vector<32x512xf32>, i32 -> vector<32x512xf32>
    %c6 = arith.constant 6 : index
    %c0_21 = arith.constant 0 : index
    %c0_22 = arith.constant 0 : index
    %44 = vector.load %arg4[%c6, %c0_21, %c0_22] : memref<9x32x512xf32, #tpu.memory_space<vmem>>, vector<1x32x512xf32>
    %45 = vector.shape_cast %44 : vector<1x32x512xf32> to vector<32x512xf32>
    %46 = arith.mulf %43, %45 : vector<32x512xf32>
    %47 = arith.addf %42, %46 : vector<32x512xf32>
    %c496_i32 = arith.constant 496 : i32
    %48 = tpu.dynamic_rotate %12 by %c496_i32 dim 1 : vector<32x512xf32>, i32 -> vector<32x512xf32>
    %c7 = arith.constant 7 : index
    %c0_23 = arith.constant 0 : index
    %c0_24 = arith.constant 0 : index
    %49 = vector.load %arg4[%c7, %c0_23, %c0_24] : memref<9x32x512xf32, #tpu.memory_space<vmem>>, vector<1x32x512xf32>
    %50 = vector.shape_cast %49 : vector<1x32x512xf32> to vector<32x512xf32>
    %51 = arith.mulf %48, %50 : vector<32x512xf32>
    %52 = arith.addf %47, %51 : vector<32x512xf32>
    %c495_i32 = arith.constant 495 : i32
    %53 = tpu.dynamic_rotate %12 by %c495_i32 dim 1 : vector<32x512xf32>, i32 -> vector<32x512xf32>
    %c8 = arith.constant 8 : index
    %c0_25 = arith.constant 0 : index
    %c0_26 = arith.constant 0 : index
    %54 = vector.load %arg4[%c8, %c0_25, %c0_26] : memref<9x32x512xf32, #tpu.memory_space<vmem>>, vector<1x32x512xf32>
    %55 = vector.shape_cast %54 : vector<1x32x512xf32> to vector<32x512xf32>
    %56 = arith.mulf %53, %55 : vector<32x512xf32>
    %57 = arith.addf %52, %56 : vector<32x512xf32>
    %c0_27 = arith.constant 0 : index
    %c0_28 = arith.constant 0 : index
    %58 = vector.load %arg5[%c0_27, %c0_28] : memref<32x1xf32, #tpu.memory_space<vmem>>, vector<32x1xf32>
    %59 = vector.broadcast %58 : vector<32x1xf32> to vector<32x512xf32>
    %60 = arith.addf %57, %59 : vector<32x512xf32>
    %cst_29 = arith.constant 0.000000e+00 : f32
    %61 = vector.broadcast %cst_29 : f32 to vector<32x512xf32>
    %62 = arith.subf %61, %60 : vector<32x512xf32>
    %63 = math.exp %62 : vector<32x512xf32>
    %cst_30 = arith.constant 1.000000e+00 : f32
    %64 = vector.broadcast %cst_30 : f32 to vector<32x512xf32>
    %65 = arith.addf %64, %63 : vector<32x512xf32>
    %66 = tpu.reciprocal %65 {approx = true} : vector<32x512xf32> -> vector<32x512xf32>
    %67 = arith.mulf %60, %66 : vector<32x512xf32>
    %68 = vector.extract_strided_slice %67 {offsets = [0, 0], sizes = [32, 256], strides = [1, 1]} : vector<32x512xf32> to vector<32x256xf32>
    %cst_31 = arith.constant dense<0.000000e+00> : vector<32xf32>
    %69 = vector.multi_reduction <add>, %68, %cst_31 [1] : vector<32x256xf32> to vector<32xf32>
    %70 = vector.shape_cast %69 : vector<32xf32> to vector<32x1xf32>
    %cst_32 = arith.constant 3.906250e-03 : f32
    %71 = vector.broadcast %cst_32 : f32 to vector<32x1xf32>
    %72 = arith.mulf %70, %71 : vector<32x1xf32>
    %c0_33 = arith.constant 0 : index
    %c0_34 = arith.constant 0 : index
    %73 = vector.load %arg6[%c0_33, %c0_34] : memref<32x8xf32, #tpu.memory_space<vmem>>, vector<32x8xf32>
    %74 = vector.broadcast %72 : vector<32x1xf32> to vector<32x8xf32>
    %75 = arith.mulf %74, %73 : vector<32x8xf32>
    %cst_35 = arith.constant dense<0.000000e+00> : vector<8xf32>
    %76 = vector.multi_reduction <add>, %75, %cst_35 [0] : vector<32x8xf32> to vector<8xf32>
    %77 = vector.shape_cast %76 : vector<8xf32> to vector<1x8xf32>
    %c0_36 = arith.constant 0 : index
    %c0_37 = arith.constant 0 : index
    %78 = vector.load %arg7[%c0_36, %c0_37] : memref<1x8xf32, #tpu.memory_space<vmem>>, vector<1x8xf32>
    %79 = arith.addf %77, %78 : vector<1x8xf32>
    %cst_38 = arith.constant 0.000000e+00 : f32
    %80 = vector.broadcast %cst_38 : f32 to vector<1x8xf32>
    %81 = arith.subf %80, %79 : vector<1x8xf32>
    %82 = math.exp %81 : vector<1x8xf32>
    %cst_39 = arith.constant 1.000000e+00 : f32
    %83 = vector.broadcast %cst_39 : f32 to vector<1x8xf32>
    %84 = arith.addf %83, %82 : vector<1x8xf32>
    %85 = tpu.reciprocal %84 {approx = true} : vector<1x8xf32> -> vector<1x8xf32>
    %86 = arith.mulf %79, %85 : vector<1x8xf32>
    %c0_40 = arith.constant 0 : index
    %c0_41 = arith.constant 0 : index
    %87 = vector.load %arg8[%c0_40, %c0_41] : memref<32x8xf32, #tpu.memory_space<vmem>>, vector<32x8xf32>
    %88 = vector.broadcast %86 : vector<1x8xf32> to vector<32x8xf32>
    %89 = arith.mulf %88, %87 : vector<32x8xf32>
    %cst_42 = arith.constant dense<0.000000e+00> : vector<32xf32>
    %90 = vector.multi_reduction <add>, %89, %cst_42 [1] : vector<32x8xf32> to vector<32xf32>
    %91 = vector.shape_cast %90 : vector<32xf32> to vector<32x1xf32>
    %c0_43 = arith.constant 0 : index
    %c0_44 = arith.constant 0 : index
    %92 = vector.load %arg9[%c0_43, %c0_44] : memref<32x1xf32, #tpu.memory_space<vmem>>, vector<32x1xf32>
    %93 = arith.addf %91, %92 : vector<32x1xf32>
    %cst_45 = arith.constant 0.000000e+00 : f32
    %94 = vector.broadcast %cst_45 : f32 to vector<32x1xf32>
    %95 = arith.subf %94, %93 : vector<32x1xf32>
    %96 = math.exp %95 : vector<32x1xf32>
    %cst_46 = arith.constant 1.000000e+00 : f32
    %97 = vector.broadcast %cst_46 : f32 to vector<32x1xf32>
    %98 = arith.addf %97, %96 : vector<32x1xf32>
    %99 = tpu.reciprocal %98 {approx = true} : vector<32x1xf32> -> vector<32x1xf32>
    %100 = vector.broadcast %99 : vector<32x1xf32> to vector<32x256xf32>
    %101 = arith.mulf %68, %100 : vector<32x256xf32>
    %102 = vector.extract_strided_slice %67 {offsets = [0, 256], sizes = [32, 256], strides = [1, 1]} : vector<32x512xf32> to vector<32x256xf32>
    %cst_47 = arith.constant dense<0.000000e+00> : vector<32xf32>
    %103 = vector.multi_reduction <add>, %102, %cst_47 [1] : vector<32x256xf32> to vector<32xf32>
    %104 = vector.shape_cast %103 : vector<32xf32> to vector<32x1xf32>
    %cst_48 = arith.constant 3.906250e-03 : f32
    %105 = vector.broadcast %cst_48 : f32 to vector<32x1xf32>
    %106 = arith.mulf %104, %105 : vector<32x1xf32>
    %c0_49 = arith.constant 0 : index
    %c0_50 = arith.constant 0 : index
    %107 = vector.load %arg6[%c0_49, %c0_50] : memref<32x8xf32, #tpu.memory_space<vmem>>, vector<32x8xf32>
    %108 = vector.broadcast %106 : vector<32x1xf32> to vector<32x8xf32>
    %109 = arith.mulf %108, %107 : vector<32x8xf32>
    %cst_51 = arith.constant dense<0.000000e+00> : vector<8xf32>
    %110 = vector.multi_reduction <add>, %109, %cst_51 [0] : vector<32x8xf32> to vector<8xf32>
    %111 = vector.shape_cast %110 : vector<8xf32> to vector<1x8xf32>
    %c0_52 = arith.constant 0 : index
    %c0_53 = arith.constant 0 : index
    %112 = vector.load %arg7[%c0_52, %c0_53] : memref<1x8xf32, #tpu.memory_space<vmem>>, vector<1x8xf32>
    %113 = arith.addf %111, %112 : vector<1x8xf32>
    %cst_54 = arith.constant 0.000000e+00 : f32
    %114 = vector.broadcast %cst_54 : f32 to vector<1x8xf32>
    %115 = arith.subf %114, %113 : vector<1x8xf32>
    %116 = math.exp %115 : vector<1x8xf32>
    %cst_55 = arith.constant 1.000000e+00 : f32
    %117 = vector.broadcast %cst_55 : f32 to vector<1x8xf32>
    %118 = arith.addf %117, %116 : vector<1x8xf32>
    %119 = tpu.reciprocal %118 {approx = true} : vector<1x8xf32> -> vector<1x8xf32>
    %120 = arith.mulf %113, %119 : vector<1x8xf32>
    %c0_56 = arith.constant 0 : index
    %c0_57 = arith.constant 0 : index
    %121 = vector.load %arg8[%c0_56, %c0_57] : memref<32x8xf32, #tpu.memory_space<vmem>>, vector<32x8xf32>
    %122 = vector.broadcast %120 : vector<1x8xf32> to vector<32x8xf32>
    %123 = arith.mulf %122, %121 : vector<32x8xf32>
    %cst_58 = arith.constant dense<0.000000e+00> : vector<32xf32>
    %124 = vector.multi_reduction <add>, %123, %cst_58 [1] : vector<32x8xf32> to vector<32xf32>
    %125 = vector.shape_cast %124 : vector<32xf32> to vector<32x1xf32>
    %c0_59 = arith.constant 0 : index
    %c0_60 = arith.constant 0 : index
    %126 = vector.load %arg9[%c0_59, %c0_60] : memref<32x1xf32, #tpu.memory_space<vmem>>, vector<32x1xf32>
    %127 = arith.addf %125, %126 : vector<32x1xf32>
    %cst_61 = arith.constant 0.000000e+00 : f32
    %128 = vector.broadcast %cst_61 : f32 to vector<32x1xf32>
    %129 = arith.subf %128, %127 : vector<32x1xf32>
    %130 = math.exp %129 : vector<32x1xf32>
    %cst_62 = arith.constant 1.000000e+00 : f32
    %131 = vector.broadcast %cst_62 : f32 to vector<32x1xf32>
    %132 = arith.addf %131, %130 : vector<32x1xf32>
    %133 = tpu.reciprocal %132 {approx = true} : vector<32x1xf32> -> vector<32x1xf32>
    %134 = vector.broadcast %133 : vector<32x1xf32> to vector<32x256xf32>
    %135 = arith.mulf %102, %134 : vector<32x256xf32>
    %136 = tpu.concatenate %101, %135 in 1 : vector<32x256xf32>, vector<32x256xf32> -> vector<32x512xf32>
    %c0_63 = arith.constant 0 : index
    %c0_64 = arith.constant 0 : index
    %137 = vector.load %arg10[%c0_63, %c0_64] : memref<8x32xf32, #tpu.memory_space<vmem>>, vector<8x32xf32>
    %cst_65 = arith.constant dense<0.000000e+00> : vector<8x512xf32>
    %138 = tpu.matmul %137, %136, %cst_65 {dimension_numbers = #tpu.dot_dimension_numbers<[1], [0], [0], [1], [0, 0, 1, 1], [], []>} : vector<8x32xf32>, vector<32x512xf32>, vector<8x512xf32> -> vector<8x512xf32>
    %c0_66 = arith.constant 0 : index
    %c0_67 = arith.constant 0 : index
    %139 = vector.load %arg11[%c0_66, %c0_67] : memref<8x1xf32, #tpu.memory_space<vmem>>, vector<8x1xf32>
    %140 = vector.broadcast %139 : vector<8x1xf32> to vector<8x512xf32>
    %141 = arith.addf %138, %140 : vector<8x512xf32>
    %142 = arith.addf %141, %0 : vector<8x512xf32>
    %c0_68 = arith.constant 0 : index
    %c0_69 = arith.constant 0 : index
    %143 = vector.load %arg12[%c0_68, %c0_69] : memref<8x512xf32, #tpu.memory_space<vmem>>, vector<8x512xf32>
    tpu.vector_store %arg12[%c0_68, %c0_69], %142 {strides = array<i32>} : memref<8x512xf32, #tpu.memory_space<vmem>>, vector<8x512xf32>,
    return
  }
  func.func @transform_0(%arg0: i32) -> (i32, i32) {
    %c0_i32 = arith.constant 0 : i32
    %c0_i32_0 = arith.constant 0 : i32
    return %c0_i32, %arg0 : i32, i32
  }
  func.func @transform_1(%arg0: i32) -> (i32, i32) {
    %c0_i32 = arith.constant 0 : i32
    %c0_i32_0 = arith.constant 0 : i32
    %c0_i32_1 = arith.constant 0 : i32
    return %c0_i32, %c0_i32_0 : i32, i32
  }
  func.func @transform_2(%arg0: i32) -> (i32, i32) {
    %c0_i32 = arith.constant 0 : i32
    %c0_i32_0 = arith.constant 0 : i32
    %c0_i32_1 = arith.constant 0 : i32
    return %c0_i32, %c0_i32_0 : i32, i32
  }
  func.func @transform_3(%arg0: i32) -> (i32, i32, i32) {
    %c0_i32 = arith.constant 0 : i32
    %c0_i32_0 = arith.constant 0 : i32
    %c0_i32_1 = arith.constant 0 : i32
    %c0_i32_2 = arith.constant 0 : i32
    return %c0_i32, %c0_i32_0, %c0_i32_1 : i32, i32, i32
  }
  func.func @transform_4(%arg0: i32) -> (i32, i32) {
    %c0_i32 = arith.constant 0 : i32
    %c0_i32_0 = arith.constant 0 : i32
    %c0_i32_1 = arith.constant 0 : i32
    return %c0_i32, %c0_i32_0 : i32, i32
  }
  func.func @transform_5(%arg0: i32) -> (i32, i32) {
    %c0_i32 = arith.constant 0 : i32
    %c0_i32_0 = arith.constant 0 : i32
    %c0_i32_1 = arith.constant 0 : i32
    return %c0_i32, %c0_i32_0 : i32, i32
  }
  func.func @transform_6(%arg0: i32) -> (i32, i32) {
    %c0_i32 = arith.constant 0 : i32
    %c0_i32_0 = arith.constant 0 : i32
    %c0_i32_1 = arith.constant 0 : i32
    return %c0_i32, %c0_i32_0 : i32, i32
  }
  func.func @transform_7(%arg0: i32) -> (i32, i32) {
    %c0_i32 = arith.constant 0 : i32
    %c0_i32_0 = arith.constant 0 : i32
    %c0_i32_1 = arith.constant 0 : i32
    return %c0_i32, %c0_i32_0 : i32, i32
  }
  func.func @transform_8(%arg0: i32) -> (i32, i32) {
    %c0_i32 = arith.constant 0 : i32
    %c0_i32_0 = arith.constant 0 : i32
    %c0_i32_1 = arith.constant 0 : i32
    return %c0_i32, %c0_i32_0 : i32, i32
  }
  func.func @transform_9(%arg0: i32) -> (i32, i32) {
    %c0_i32 = arith.constant 0 : i32
    %c0_i32_0 = arith.constant 0 : i32
    %c0_i32_1 = arith.constant 0 : i32
    return %c0_i32, %c0_i32_0 : i32, i32
  }
  func.func @transform_10(%arg0: i32) -> (i32, i32) {
    %c0_i32 = arith.constant 0 : i32
    %c0_i32_0 = arith.constant 0 : i32
    %c0_i32_1 = arith.constant 0 : i32
    return %c0_i32, %c0_i32_0 : i32, i32
  }
  func.func @transform_11(%arg0: i32) -> (i32, i32) {
    %c0_i32 = arith.constant 0 : i32
    %c0_i32_0 = arith.constant 0 : i32
    return %c0_i32, %arg0 : i32, i32
  }
}

</mosaic_0001>

<bundles_post_ra>
// kernel: tpu_custom_call.1
= control target key start
LH: loop header
LB: loop body
LE: loop exit
PB: predicated region body
PF: predicated region fallthrough
CT: control target
= control target key end

     0   :  { %16 = vsyncpa [#allocation3], 0  ;;  %s3301_s0 = inlined_call_operand.vmem [shape: f32[8,512], index: 0, kind: input, shape index: {}]   ;;  %s3302_s1 = inlined_call_operand.vmem [shape: f32[32,8], index: 1, kind: input, shape index: {}]   ;;  %s3303_s2 = inlined_call_operand.vmem [shape: f32[32,1], index: 2, kind: input, shape index: {}]   ;;  %s3304_s3 = inlined_call_operand.hbm [shape: f32[9,32,512], index: 3, kind: input, shape index: {}]   ;;  %s3305_s4 = inlined_call_operand.vmem [shape: f32[32,1], index: 4, kind: input, shape index: {}]   ;;  %s3306_s5 = inlined_call_operand.vmem [shape: f32[32,8], index: 5, kind: input, shape index: {}]   ;;  %s3307_s6 = inlined_call_operand.vmem [shape: f32[1,8], index: 6, kind: input, shape index: {}]   ;;  %s3308_s7 = inlined_call_operand.vmem [shape: f32[32,8], index: 7, kind: input, shape index: {}]   ;;  %s3309_s8 = inlined_call_operand.vmem [shape: f32[32,1], index: 8, kind: input, shape index: {}]   ;;  %s3310_s9 = inlined_call_operand.vmem [shape: f32[8,32], index: 9, kind: input, shape index: {}]   ;;  %s3311_s10 = inlined_call_operand.vmem [shape: f32[8,1], index: 10, kind: input, shape index: {}]   ;;  %s3312_s11 = inlined_call_operand.hbm [shape: f32[8,512], index: 11, kind: output, shape index: {}]  }
   0x1   :  { %17 = vsyncpa [#allocation4], 0  ;;  %s2017_s17 = smov [#allocation2]   ;;  %s1969_s21 = scalar_lea.hbm %s3304_s3, 18432 }
   0x2   :  { %s29_s18 = sshll.u32 %s2017_s17, 4  ;;  %p1970_p0 = scmp.ne.s32.totalorder %s3304_s3, %s1969_s21  ;;  %s30_s18 = int_to_ptr.vmem [resolvable:$true] %s29_s18 }
   0x3   :  { %p1973_p1 = scmp.lt.u32.totalorder %s1969_s21, %s3304_s3 }
   0x5   :  { %p1975_p2 = pnand %p1973_p1, %p1970_p0 }
   0x7   :  { %1978 = shalt.err (!%p1975_p2)
}
   0x8   :  { %s1979_s26 = scalar_lea.vmem %s30_s18, 18432  ;;  %p1984_p4 = scmp.lt.s32.totalorder %s30_s18, %s30_s18 }
   0x9   :  { %p1980_p3 = scmp.ne.s32.totalorder %s30_s18, %s1979_s26  ;;  %p1985_p5 = scmp.lt.s32.totalorder %s1979_s26, %s1979_s26 }
   0xb   :  { %p1986_p6 = por %p1985_p5, %p1984_p4 }
   0xd   :  { %p1987_p7 = pnand %p1986_p6, %p1980_p3 }
   0xf   :  { %1990 = shalt.err (!%p1987_p7)
}
  0x10   :  { %s2018_s27 = smov 512   ;;  %s2019_s28 = smov 32  }
  0x11   :  { %35 = dma.hbm_to_vmem [thread:$0]  %s3304_s3, 18432, %s30_s18, [#allocation3], %s2018_s27, %s2018_s27, %s2019_s28  }
  0x12   :  { %2013 = dma.done.wait [#allocation3], 18432  }
  0x13   :  { %2014 = vsyncadd [#allocation3], 4294948864  ;;  %v2020_v0 = vmov 0.0   ;;  %v2021_v1 = vmov 0   ;;  %v54_v2 = vld [vmem:[%s3301_s0 + $0x8] sm:$0xff]  ;;  %v56_v3 = vld [vmem:[%s3301_s0 + $0x18] sm:$0xff] }
  0x14   :  { %162 = vmatprep.mubr.f32.mxu0 %v2020_v0  ;;  %251 = vmatprep.mubr.f32.mxu1 %v2020_v0  ;;  %v53_v4 = vld [vmem:[%s3301_s0] sm:$0xff]  ;;  %vm85_vm0 = vcmask 64512   ;;  %v55_v5 = vld [vmem:[%s3301_s0 + $0x10] sm:$0xff]  ;;  %v58_v8 = vld [vmem:[%s3302_s1 + $0x8] sm:$0xff]  ;;  %s2024_s22 = smov 15   ;;  %s2025_s23 = smov 1  }
  0x15   :  { %1795 = vset.pattern.permute.xlu0 %v2021_v1  ;;  %1796 = vset.pattern.permute.xlu1 %v2021_v1  ;;  %v57_v6 = vld [vmem:[%s3302_s1] sm:$0xff]  ;;  %v63_v9 = vld [vmem:[%s3303_s2 + $0x10] sm:$0xff]  ;;  %v62_v10 = vld [vmem:[%s3303_s2 + $0x8] sm:$0xff]  ;;  %s2026_s24 = smov 127   ;;  %s2027_s25 = smov 113   ;;  %vm1586_vm9 = vcmask 261120  }
  0x16   :  { %98 = vmatprep.subr.mxu0 %v54_v2  ;;  %187 = vmatprep.subr.mxu1 %v56_v3  ;;  %v61_v7 = vld [vmem:[%s3303_s2] sm:$0xff]  ;;  %v64_v11 = vld [vmem:[%s3303_s2 + $0x18] sm:$0xff]  ;;  %v59_v12 = vld [vmem:[%s3302_s1 + $0x10] sm:$0xff]  ;;  %s2028_s26 = smov 112   ;;  %s2029_s27 = smov 111  }
  0x17   :  { %99 = vmatpush1.msra.mxu0 %v53_v4  ;;  %188 = vmatpush1.msra.mxu1 %v55_v5  ;;  %v1206_v13 = vld [vmem:[%s3305_s4] sm:$0xff]  ;;  %v60_v14 = vld [vmem:[%s3302_s1 + $0x18] sm:$0xff]  ;;  %v1207_v15 = vld [vmem:[%s3305_s4 + $0x8] sm:$0xff]  ;;  %s2022_s1 = smov 17  }
  0x18   :  { %1755 = vmatmul.mubr.msk.f32.vlgmr.msra.gmra.mrb[0].mxu0 %vm85_vm0, %v57_v6  ;;  %1759 = vmatmul.mubr.msk.f32.vlgmr.msra.gmra.mrb[0].mxu1 %vm85_vm0, %v57_v6  ;;  %v1208_v16 = vld [vmem:[%s3305_s4 + $0x10] sm:$0xff]  ;;  %v1209_v17 = vld [vmem:[%s3305_s4 + $0x18] sm:$0xff]  ;;  %s2023_s4 = smov 16  }
  0x19   :  { %168 = vmatprep.mubr.f32.mxu0 %v2020_v0  ;;  %257 = vmatprep.mubr.f32.mxu1 %v2020_v0 }
  0x1a   :  { %67 = vperm.xlu0 %1795, %v61_v7   ;;  %77 = vperm.xlu1 %1796, %v63_v9  }
  0x1c   :  { %1756 = vmatmul.mubr.msk.f32.gmra.mrb[2].mxu0 %vm85_vm0, %v58_v8  ;;  %1760 = vmatmul.mubr.msk.f32.gmra.mrb[2].mxu1 %vm85_vm0, %v58_v8 }
  0x1d   :  { %174 = vmatprep.mubr.f32.mxu0 %v2020_v0  ;;  %263 = vmatprep.mubr.f32.mxu1 %v2020_v0 }
  0x1e   :  { %72 = vperm.xlu0 %1795, %v62_v10   ;;  %82 = vperm.xlu1 %1796, %v64_v11  }
  0x20   :  { %1757 = vmatmul.mubr.msk.f32.gmra.mrb[4].mxu0 %vm85_vm0, %v59_v12  ;;  %1761 = vmatmul.mubr.msk.f32.gmra.mrb[4].mxu1 %vm85_vm0, %v59_v12 }
  0x21   :  { %180 = vmatprep.mubr.f32.mxu0 %v2020_v0  ;;  %269 = vmatprep.mubr.f32.mxu1 %v2020_v0 }
  0x22   :  { %1212 = vperm.xlu0 %1795, %v1206_v13   ;;  %1217 = vperm.xlu1 %1796, %v1207_v15  }
  0x24   :  { %1758 = vmatmul.mubr.msk.f32.gmra.mrb[6].mxu0 %vm85_vm0, %v60_v14  ;;  %1762 = vmatmul.mubr.msk.f32.gmra.mrb[6].mxu1 %vm85_vm0, %v60_v14 }
  0x25   :  { %1654 = vmatprep.mubr.f32.mxu0 %v2020_v0  ;;  %1725 = vmatprep.mubr.f32.mxu1 %v2020_v0 }
  0x26   :  { %1222 = vperm.xlu0 %1795, %v1208_v16   ;;  %1227 = vperm.xlu1 %1796, %v1209_v17  }
  0x99   :  { %v2159_v18 = vpop.permute.xlu0 %67 }
  0x9d   :  { %v2165_v25 = vpop.permute.xlu0 %72 }
  0xeb   :  { %v164_v19 = vpop.f32.mrb[0].mxu0  ;;  %v253_v20 = vpop.f32.mrb[0].mxu1 }
  0xec   :  { %v165_v21 = vadd.f32 %v164_v19, %v2159_v18  ;;  %v254_v22 = vadd.f32 %v253_v20, %v2159_v18  ;;  %v166_v23 = vpop.f32.mrb[1].mxu0  ;;  %v2163_v24 = vpop.f32.mrb[1].mxu1 }
  0xed   :  { %v167_v0 = vadd.f32 %v166_v23, %v2159_v18  ;;  %v256_v1 = vadd.f32 %v2163_v24, %v2159_v18 }
  0xee   :  { %v276_v26 = vsub.f32 0.0, %v165_v21  ;;  %v278_v27 = vsub.f32 0.0, %v254_v22 }
  0xef   :  { %v170_v28 = vpop.f32.mrb[2].mxu0  ;;  %v259_v29 = vpop.f32.mrb[2].mxu1  ;;  %v277_v2 = vsub.f32 0.0, %v167_v0  ;;  %v279_v4 = vsub.f32 0.0, %v256_v1 }
  0xf0   :  { %v292_v30 = vmul.f32 1.442695, %v276_v26  ;;  %v296_v31 = vmul.f32 1.442695, %v278_v27  ;;  %v171_v32 = vadd.f32 %v170_v28, %v2165_v25  ;;  %v260_v33 = vadd.f32 %v259_v29, %v2165_v25  ;;  %v172_v34 = vpop.f32.mrb[3].mxu0  ;;  %v261_v35 = vpop.f32.mrb[3].mxu1 }
  0xf1   :  { %v173_v3 = vadd.f32 %v172_v34, %v2165_v25  ;;  %v294_v5 = vmul.f32 1.442695, %v277_v2  ;;  %v262_v7 = vadd.f32 %v261_v35, %v2165_v25  ;;  %v298_v8 = vmul.f32 1.442695, %v279_v4  ;;  %v78_v28 = vpop.permute.xlu1 %77 }
  0xf2   :  { %1797 = vpow2.f32 %v292_v30  ;;  %v280_v36 = vsub.f32 0.0, %v171_v32  ;;  %v282_v37 = vsub.f32 0.0, %v260_v33 }
  0xf3   :  { %1799 = vpow2.f32 %v296_v31  ;;  %v2169_v38 = vpop.f32.mrb[4].mxu0  ;;  %v2171_v39 = vpop.f32.mrb[4].mxu1  ;;  %v281_v6 = vsub.f32 0.0, %v173_v3  ;;  %v283_v10 = vsub.f32 0.0, %v262_v7 }
  0xf4   :  { %v300_v40 = vmul.f32 1.442695, %v280_v36  ;;  %v304_v41 = vmul.f32 1.442695, %v282_v37  ;;  %v2173_v42 = vpop.f32.mrb[5].mxu0  ;;  %v2175_v43 = vpop.f32.mrb[5].mxu1  ;;  %v177_v29 = vadd.f32 %v2169_v38, %v78_v28  ;;  %v2294_v31 = vadd.f32 %v2171_v39, %v78_v28 }
  0xf5   :  { %v302_v9 = vmul.f32 1.442695, %v281_v6  ;;  %v306_v11 = vmul.f32 1.442695, %v283_v10  ;;  %v2306_v35 = vadd.f32 %v2173_v42, %v78_v28  ;;  %v2314_v37 = vadd.f32 %v2175_v43, %v78_v28  ;;  %v2320_v38 = vpop.permute.xlu0 %1212 }
  0xf6   :  { %1801 = vpow2.f32 %v300_v40  ;;  %v284_v30 = vsub.f32 0.0, %v177_v29  ;;  %3334 = vst [vmem:[#allocation8_spill] sm:$0xff] %v2320_v38  ;;  %v772_v38 = vld [vmem:[#allocation2 + $0x230] sm:$0xff] }
  0xf7   :  { %1803 = vpow2.f32 %v304_v41  ;;  %v2177_v44 = vpop.f32.mrb[6].mxu0  ;;  %v2179_v45 = vpop.f32.mrb[6].mxu1  ;;  %v285_v36 = vsub.f32 0.0, %v2306_v35  ;;  %v287_v40 = vsub.f32 0.0, %v2314_v37 }
  0xf8   :  { %v2181_v46 = vpop.f32.mrb[7].mxu0  ;;  %v2183_v47 = vpop.f32.mrb[7].mxu1 }
  0xf9   :  { %v310_v39 = vmul.f32 1.442695, %v285_v36  ;;  %v2323_v41 = vpop.permute.xlu1 %82  ;;  %v314_v43 = vmul.f32 1.442695, %v287_v40 }
  0xfc   :  { %v1798_v48 = vpop.eup %1797 }
  0xfd   :  { %v1800_v49 = vpop.eup %1799  ;;  %v324_v50 = vadd.f32 1.0, %v1798_v48  ;;  %v2329_v48 = vpop.permute.xlu1 %1217 }
  0xfe   :  { %v326_v51 = vadd.f32 1.0, %v1800_v49  ;;  %3335 = vst [vmem:[#allocation9_spill] sm:$0xff] %v2329_v48 }
  0xff   :  { %1805 = vrcp.f32 %v324_v50 }
 0x100   :  { %v1802_v52 = vpop.eup %1801  ;;  %1807 = vrcp.f32 %v326_v51  ;;  %v2335_v51 = vpop.permute.xlu0 %1222 }
 0x101   :  { %v1804_v53 = vpop.eup %1803  ;;  %v328_v54 = vadd.f32 1.0, %v1802_v52  ;;  %3336 = vst [vmem:[#allocation10_spill] sm:$0xff] %v2335_v51 }
 0x102   :  { %v330_v55 = vadd.f32 1.0, %v1804_v53  ;;  %v2341_v53 = vpop.permute.xlu1 %1227 }
 0x103   :  { %1809 = vrcp.f32 %v328_v54  ;;  %3337 = vst [vmem:[#allocation11_spill] sm:$0xff] %v2341_v53  ;;  %v768_v53 = vld [vmem:[#allocation2 + $0x210] sm:$0xff] }
 0x104   :  { %1811 = vrcp.f32 %v330_v55 }
 0x105   :  { %1813 = vpow2.f32 %v294_v5 }
 0x106   :  { %1815 = vpow2.f32 %v298_v8 }
 0x107   :  { %1817 = vpow2.f32 %v302_v9 }
 0x108   :  { %1819 = vpow2.f32 %v306_v11 }
 0x109   :  { %v1806_v56 = vpop.eup %1805 }
 0x10a   :  { %v2185_v57 = vmul.f32 %v1806_v56, %v165_v21  ;;  %v1808_v58 = vpop.eup %1807 }
 0x10b   :  { %v2189_v60 = vmul.f32 %v1808_v58, %v254_v22 }
 0x10c   :  { %372 = vrot.lane.b32.xlu0 %v2185_v57, %s2022_s1 }
 0x10d   :  { %v1810_v59 = vpop.eup %1809 }
 0x10e   :  { %v2191_v61 = vmul.f32 %v1810_v59, %v171_v32  ;;  %v1812_v62 = vpop.eup %1811  ;;  %v308_v32 = vmul.f32 1.442695, %v284_v30  ;;  %v2434_v30 = vadd.f32 %v2179_v45, %v2323_v41 }
 0x10f   :  { %v2197_v63 = vmul.f32 %v1812_v62, %v260_v33  ;;  %v1814_v12 = vpop.eup %1813  ;;  %v286_v33 = vsub.f32 0.0, %v2294_v31 }
 0x110   :  { %374 = vrot.lane.b32.xlu1 %v2191_v61, %s2022_s1  ;;  %388 = vrot.lane.b32.xlu0 %v2189_v60, %s2022_s1  ;;  %v1816_v13 = vpop.eup %1815  ;;  %v325_v14 = vadd.f32 1.0, %v1814_v12 }
 0x111   :  { %v1818_v15 = vpop.eup %1817  ;;  %v327_v16 = vadd.f32 1.0, %v1816_v13  ;;  %v312_v34 = vmul.f32 1.442695, %v286_v33 }
 0x112   :  { %1821 = vrcp.f32 %v325_v14  ;;  %v329_v17 = vadd.f32 1.0, %v1818_v15  ;;  %v1820_v18 = vpop.eup %1819 }
 0x113   :  { %1823 = vrcp.f32 %v327_v16  ;;  %v331_v19 = vadd.f32 1.0, %v1820_v18 }
 0x114   :  { %390 = vrot.lane.b32.xlu1 %v2197_v63, %s2022_s1  ;;  %471 = vrot.lane.b32.xlu0 %v2185_v57, %s2023_s4  ;;  %1825 = vrcp.f32 %v329_v17 }
 0x115   :  { %1827 = vrcp.f32 %v331_v19 }
 0x116   :  { %1829 = vpow2.f32 %v308_v32  ;;  %v2447_v32 = vadd.f32 %v2183_v47, %v2323_v41 }
 0x117   :  { %1831 = vpow2.f32 %v312_v34  ;;  %v290_v34 = vsub.f32 0.0, %v2434_v30 }
 0x118   :  { %473 = vrot.lane.b32.xlu1 %v2191_v61, %s2023_s4  ;;  %487 = vrot.lane.b32.xlu0 %v2189_v60, %s2023_s4  ;;  %1833 = vpow2.f32 %v310_v39  ;;  %v291_v36 = vsub.f32 0.0, %v2447_v32 }
 0x119   :  { %1835 = vpow2.f32 %v314_v43  ;;  %v320_v39 = vmul.f32 1.442695, %v290_v34 }
 0x11c   :  { %489 = vrot.lane.b32.xlu1 %v2197_v63, %s2023_s4  ;;  %569 = vrot.lane.b32.xlu0 %v2185_v57, %s2024_s22  ;;  %v1822_v20 = vpop.eup %1821 }
 0x11d   :  { %v1824_v21 = vpop.eup %1823  ;;  %v2260_v22 = vmul.f32 %v1822_v20, %v167_v0 }
 0x11e   :  { %v1826_v23 = vpop.eup %1825  ;;  %v2266_v24 = vmul.f32 %v1824_v21, %v256_v1 }
 0x11f   :  { %v2268_v25 = vmul.f32 %v1826_v23, %v173_v3  ;;  %v1828_v26 = vpop.eup %1827 }
 0x120   :  { %571 = vrot.lane.b32.xlu1 %v2191_v61, %s2024_s22  ;;  %585 = vrot.lane.b32.xlu0 %v2189_v60, %s2024_s22  ;;  %v2274_v27 = vmul.f32 %v1828_v26, %v262_v7  ;;  %v1830_v42 = vpop.eup %1829  ;;  %v2426_v26 = vadd.f32 %v2177_v44, %v2323_v41  ;;  %v2443_v44 = vadd.f32 %v2181_v46, %v2323_v41  ;;  %v322_v41 = vmul.f32 1.442695, %v291_v36 }
 0x121   :  { %v332_v49 = vadd.f32 1.0, %v1830_v42  ;;  %v1832_v50 = vpop.eup %1831 }
 0x122   :  { %v334_v52 = vadd.f32 1.0, %v1832_v50  ;;  %v1834_v55 = vpop.eup %1833  ;;  %v289_v46 = vsub.f32 0.0, %v2443_v44 }
 0x123   :  { %1837 = vrcp.f32 %v332_v49  ;;  %v333_v59 = vadd.f32 1.0, %v1834_v55  ;;  %v1836_v62 = vpop.eup %1835 }
 0x124   :  { %587 = vrot.lane.b32.xlu1 %v2197_v63, %s2024_s22  ;;  %667 = vrot.lane.b32.xlu0 %v2185_v57, %s2025_s23  ;;  %1839 = vrcp.f32 %v334_v52  ;;  %v335_v3 = vadd.f32 1.0, %v1836_v62  ;;  %v318_v40 = vmul.f32 1.442695, %v289_v46 }
 0x125   :  { %1841 = vrcp.f32 %v333_v59 }
 0x126   :  { %1843 = vrcp.f32 %v335_v3 }
 0x128   :  { %669 = vrot.lane.b32.xlu1 %v2191_v61, %s2025_s23  ;;  %683 = vrot.lane.b32.xlu0 %v2189_v60, %s2025_s23 }
 0x12c   :  { %685 = vrot.lane.b32.xlu1 %v2197_v63, %s2025_s23  ;;  %814 = vrot.lane.b32.xlu0 %v2185_v57, %s2026_s24 }
 0x12d   :  { %v1838_v2 = vpop.eup %1837 }
 0x12e   :  { %v2365_v4 = vmul.f32 %v1838_v2, %v177_v29  ;;  %v1840_v7 = vpop.eup %1839 }
 0x12f   :  { %v2376_v8 = vmul.f32 %v1840_v7, %v2294_v31  ;;  %v1842_v13 = vpop.eup %1841  ;;  %v288_v31 = vsub.f32 0.0, %v2426_v26 }
 0x130   :  { %816 = vrot.lane.b32.xlu1 %v2191_v61, %s2026_s24  ;;  %830 = vrot.lane.b32.xlu0 %v2189_v60, %s2026_s24  ;;  %3338 = vst [vmem:[#allocation12_spill] sm:$0xff] %v2365_v4  ;;  %v2395_v14 = vmul.f32 %v1842_v13, %v2306_v35  ;;  %v1844_v17 = vpop.eup %1843 }
 0x131   :  { %3339 = vst [vmem:[#allocation13_spill] sm:$0xff] %v2376_v8  ;;  %v2406_v18 = vmul.f32 %v1844_v17, %v2314_v37  ;;  %v316_v35 = vmul.f32 1.442695, %v288_v31 }
 0x132   :  { %3340 = vst [vmem:[#allocation14_spill] sm:$0xff] %v2395_v14 }
 0x133   :  { %3341 = vst [vmem:[#allocation15_spill] sm:$0xff] %v2406_v18  ;;  %1845 = vpow2.f32 %v316_v35 }
 0x134   :  { %832 = vrot.lane.b32.xlu1 %v2197_v63, %s2026_s24  ;;  %912 = vrot.lane.b32.xlu0 %v2185_v57, %s2027_s25  ;;  %1847 = vpow2.f32 %v320_v39 }
 0x135   :  { %1849 = vpow2.f32 %v318_v40 }
 0x136   :  { %1851 = vpow2.f32 %v322_v41  ;;  %v3316_v41 = vlaneseq }
 0x138   :  { %914 = vrot.lane.b32.xlu1 %v2191_v61, %s2027_s25  ;;  %928 = vrot.lane.b32.xlu0 %v2189_v60, %s2027_s25 }
 0x13c   :  { %930 = vrot.lane.b32.xlu1 %v2197_v63, %s2027_s25  ;;  %1010 = vrot.lane.b32.xlu0 %v2185_v57, %s2028_s26 }
 0x13d   :  { %v1846_v59 = vpop.eup %1845 }
 0x13e   :  { %v1848_v62 = vpop.eup %1847  ;;  %v336_v2 = vadd.f32 1.0, %v1846_v59 }
 0x13f   :  { %v1850_v13 = vpop.eup %1849  ;;  %v338_v31 = vadd.f32 1.0, %v1848_v62 }
 0x140   :  { %1012 = vrot.lane.b32.xlu1 %v2191_v61, %s2028_s26  ;;  %1026 = vrot.lane.b32.xlu0 %v2189_v60, %s2028_s26  ;;  %v1852_v17 = vpop.eup %1851  ;;  %1853 = vrcp.f32 %v336_v2  ;;  %v337_v34 = vadd.f32 1.0, %v1850_v13  ;;  %v2515_v2 = vand.u32 127, %v3316_v41  ;;  %v770_v41 = vld [vmem:[#allocation2 + $0x220] sm:$0xff] }
 0x141   :  { %v339_v36 = vadd.f32 1.0, %v1852_v17  ;;  %1855 = vrcp.f32 %v338_v31 }
 0x142   :  { %1857 = vrcp.f32 %v337_v34  ;;  %v766_v34 = vld [vmem:[#allocation2 + $0x200] sm:$0xff]  ;;  %vm406_vm1 = vcmp.lt.s32.totalorder %v2515_v2, 17  ;;  %vm503_vm2 = vcmp.lt.s32.totalorder %v2515_v2, 16  ;;  %vm601_vm3 = vcmp.lt.s32.totalorder %v2515_v2, 15 }
 0x143   :  { %1859 = vrcp.f32 %v339_v36  ;;  %v767_v36 = vld [vmem:[#allocation2 + $0x208] sm:$0xff]  ;;  %vm699_vm4 = vcmp.lt.s32.totalorder %v2515_v2, 1  ;;  %vm846_vm5 = vcmp.lt.s32.totalorder %v2515_v2, 127  ;;  %vm944_vm6 = vcmp.lt.s32.totalorder %v2515_v2, 113 }
 0x144   :  { %1028 = vrot.lane.b32.xlu1 %v2197_v63, %s2028_s26  ;;  %1108 = vrot.lane.b32.xlu0 %v2185_v57, %s2029_s27  ;;  %vm1042_vm7 = vcmp.lt.s32.totalorder %v2515_v2, 112  ;;  %vm1140_vm8 = vcmp.lt.s32.totalorder %v2515_v2, 111 }
 0x148   :  { %1110 = vrot.lane.b32.xlu1 %v2191_v61, %s2029_s27  ;;  %1124 = vrot.lane.b32.xlu0 %v2189_v60, %s2029_s27 }
 0x14a   :  { %v1854_v13 = vpop.eup %1853 }
 0x14b   :  { %v1856_v51 = vpop.eup %1855 }
 0x14c   :  { %1126 = vrot.lane.b32.xlu1 %v2197_v63, %s2029_s27  ;;  %380 = vrot.lane.b32.xlu0 %v2260_v22, %s2022_s1  ;;  %v1858_v48 = vpop.eup %1857 }
 0x150   :  { %382 = vrot.lane.b32.xlu1 %v2268_v25, %s2022_s1  ;;  %396 = vrot.lane.b32.xlu0 %v2266_v24, %s2022_s1 }
 0x154   :  { %398 = vrot.lane.b32.xlu1 %v2274_v27, %s2022_s1  ;;  %479 = vrot.lane.b32.xlu0 %v2260_v22, %s2023_s4 }
 0x158   :  { %481 = vrot.lane.b32.xlu1 %v2268_v25, %s2023_s4  ;;  %495 = vrot.lane.b32.xlu0 %v2266_v24, %s2023_s4 }
 0x15c   :  { %497 = vrot.lane.b32.xlu1 %v2274_v27, %s2023_s4  ;;  %577 = vrot.lane.b32.xlu0 %v2260_v22, %s2024_s22 }
 0x160   :  { %579 = vrot.lane.b32.xlu1 %v2268_v25, %s2024_s22  ;;  %593 = vrot.lane.b32.xlu0 %v2266_v24, %s2024_s22 }
 0x164   :  { %595 = vrot.lane.b32.xlu1 %v2274_v27, %s2024_s22  ;;  %675 = vrot.lane.b32.xlu0 %v2260_v22, %s2025_s23 }
 0x168   :  { %677 = vrot.lane.b32.xlu1 %v2268_v25, %s2025_s23  ;;  %691 = vrot.lane.b32.xlu0 %v2266_v24, %s2025_s23 }
 0x16c   :  { %693 = vrot.lane.b32.xlu1 %v2274_v27, %s2025_s23  ;;  %822 = vrot.lane.b32.xlu0 %v2260_v22, %s2026_s24 }
 0x170   :  { %824 = vrot.lane.b32.xlu1 %v2268_v25, %s2026_s24  ;;  %838 = vrot.lane.b32.xlu0 %v2266_v24, %s2026_s24 }
 0x174   :  { %840 = vrot.lane.b32.xlu1 %v2274_v27, %s2026_s24  ;;  %920 = vrot.lane.b32.xlu0 %v2260_v22, %s2027_s25 }
 0x178   :  { %922 = vrot.lane.b32.xlu1 %v2268_v25, %s2027_s25  ;;  %936 = vrot.lane.b32.xlu0 %v2266_v24, %s2027_s25 }
 0x17c   :  { %938 = vrot.lane.b32.xlu1 %v2274_v27, %s2027_s25  ;;  %1018 = vrot.lane.b32.xlu0 %v2260_v22, %s2028_s26 }
 0x17e   :  { %v2343_v54 = vpop.permute.xlu0 %372 }
 0x180   :  { %1020 = vrot.lane.b32.xlu1 %v2268_v25, %s2028_s26  ;;  %1034 = vrot.lane.b32.xlu0 %v2266_v24, %s2028_s26 }
 0x182   :  { %v2349_v56 = vpop.permute.xlu1 %374  ;;  %v2351_v58 = vpop.permute.xlu0 %388 }
 0x184   :  { %1036 = vrot.lane.b32.xlu1 %v2274_v27, %s2028_s26  ;;  %1116 = vrot.lane.b32.xlu0 %v2260_v22, %s2029_s27 }
 0x186   :  { %v2357_v0 = vpop.permute.xlu1 %390  ;;  %v2359_v1 = vpop.permute.xlu0 %471 }
 0x188   :  { %1118 = vrot.lane.b32.xlu1 %v2268_v25, %s2029_s27  ;;  %1132 = vrot.lane.b32.xlu0 %v2266_v24, %s2029_s27 }
 0x18a   :  { %v2367_v5 = vpop.permute.xlu1 %473  ;;  %v2369_v6 = vpop.permute.xlu0 %487 }
 0x18c   :  { %1134 = vrot.lane.b32.xlu1 %v2274_v27, %s2029_s27  ;;  %376 = vrot.lane.b32.xlu0 %v2365_v4, %s2022_s1 }
 0x18e   :  { %v2378_v9 = vpop.permute.xlu1 %489  ;;  %v2380_v10 = vpop.permute.xlu0 %569 }
 0x190   :  { %1112 = vrot.lane.b32.xlu1 %v2365_v4, %s2029_s27  ;;  %392 = vrot.lane.b32.xlu0 %v2376_v8, %s2022_s1 }
 0x192   :  { %v2386_v11 = vpop.permute.xlu1 %571  ;;  %v2388_v12 = vpop.permute.xlu0 %585 }
 0x194   :  { %1128 = vrot.lane.b32.xlu1 %v2376_v8, %s2029_s27  ;;  %475 = vrot.lane.b32.xlu0 %v2365_v4, %s2023_s4 }
 0x196   :  { %v2397_v15 = vpop.permute.xlu1 %587  ;;  %v2399_v16 = vpop.permute.xlu0 %667 }
 0x198   :  { %384 = vrot.lane.b32.xlu1 %v2395_v14, %s2022_s1  ;;  %491 = vrot.lane.b32.xlu0 %v2376_v8, %s2023_s4 }
 0x19a   :  { %v2408_v19 = vpop.permute.xlu1 %669  ;;  %v2410_v20 = vpop.permute.xlu0 %683 }
 0x19c   :  { %400 = vrot.lane.b32.xlu1 %v2406_v18, %s2022_s1  ;;  %573 = vrot.lane.b32.xlu0 %v2365_v4, %s2024_s22 }
 0x19e   :  { %v2416_v21 = vpop.permute.xlu1 %685  ;;  %v2418_v23 = vpop.permute.xlu0 %814 }
 0x1a0   :  { %483 = vrot.lane.b32.xlu1 %v2395_v14, %s2023_s4  ;;  %589 = vrot.lane.b32.xlu0 %v2376_v8, %s2024_s22 }
 0x1a2   :  { %v2428_v28 = vpop.permute.xlu1 %816  ;;  %v2430_v29 = vpop.permute.xlu0 %830 }
 0x1a4   :  { %499 = vrot.lane.b32.xlu1 %v2406_v18, %s2023_s4  ;;  %671 = vrot.lane.b32.xlu0 %v2365_v4, %s2025_s23 }
 0x1a6   :  { %v2449_v33 = vpop.permute.xlu1 %832  ;;  %v2451_v45 = vpop.permute.xlu0 %912 }
 0x1a7   :  { %3342 = vst [vmem:[#allocation16_spill] sm:$0xff] %v2451_v45 }
 0x1a8   :  { %581 = vrot.lane.b32.xlu1 %v2395_v14, %s2024_s22  ;;  %687 = vrot.lane.b32.xlu0 %v2376_v8, %s2025_s23 }
 0x1aa   :  { %v2460_v37 = vpop.permute.xlu1 %914  ;;  %v2462_v47 = vpop.permute.xlu0 %928 }
 0x1ab   :  { %3343 = vst [vmem:[#allocation17_spill] sm:$0xff] %v2460_v37  ;;  %3344 = vst [vmem:[#allocation18_spill] sm:$0xff] %v2462_v47  ;;  %v426_v37 = vld [vmem:[#allocation2 + $0x18] sm:$0xff]  ;;  %v427_v47 = vld [vmem:[#allocation2 + $0x20] sm:$0xff] }
 0x1ac   :  { %597 = vrot.lane.b32.xlu1 %v2406_v18, %s2024_s22  ;;  %818 = vrot.lane.b32.xlu0 %v2365_v4, %s2026_s24 }
 0x1ae   :  { %v2468_v42 = vpop.permute.xlu1 %930  ;;  %v2470_v43 = vpop.permute.xlu0 %1010 }
 0x1af   :  { %3345 = vst [vmem:[#allocation19_spill] sm:$0xff] %v2468_v42  ;;  %3346 = vst [vmem:[#allocation20_spill] sm:$0xff] %v2470_v43  ;;  %v2562_v43 = vmul.f32 %v772_v38, %v2197_v63  ;;  %v423_v42 = vld [vmem:[#allocation2] sm:$0xff] }
 0x1b0   :  { %679 = vrot.lane.b32.xlu1 %v2395_v14, %s2025_s23  ;;  %834 = vrot.lane.b32.xlu0 %v2376_v8, %s2026_s24 }
 0x1b1   :  { %3357 = vst [vmem:[#allocation31_spill] sm:$0xff] %v2562_v43 }
 0x1b2   :  { %v2476_v49 = vpop.permute.xlu1 %1012  ;;  %v2478_v50 = vpop.permute.xlu0 %1026 }
 0x1b3   :  { %3347 = vst [vmem:[#allocation21_spill] sm:$0xff] %v2476_v49  ;;  %3348 = vst [vmem:[#allocation22_spill] sm:$0xff] %v2478_v50 }
 0x1b4   :  { %695 = vrot.lane.b32.xlu1 %v2406_v18, %s2025_s23  ;;  %916 = vrot.lane.b32.xlu0 %v2365_v4, %s2027_s25 }
 0x1b6   :  { %v2484_v52 = vpop.permute.xlu1 %1028  ;;  %v2486_v55 = vpop.permute.xlu0 %1108 }
 0x1b7   :  { %3349 = vst [vmem:[#allocation23_spill] sm:$0xff] %v2484_v52  ;;  %3350 = vst [vmem:[#allocation24_spill] sm:$0xff] %v2486_v55  ;;  %v773_v55 = vld [vmem:[#allocation2 + $0x238] sm:$0xff] }
 0x1b8   :  { %826 = vrot.lane.b32.xlu1 %v2395_v14, %s2026_s24  ;;  %932 = vrot.lane.b32.xlu0 %v2376_v8, %s2027_s25 }
 0x1ba   :  { %v2492_v3 = vpop.permute.xlu1 %1110  ;;  %v2494_v7 = vpop.permute.xlu0 %1124 }
 0x1bb   :  { %3351 = vst [vmem:[#allocation25_spill] sm:$0xff] %v2492_v3  ;;  %3352 = vst [vmem:[#allocation26_spill] sm:$0xff] %v2494_v7  ;;  %v1860_v3 = vpop.eup %1859  ;;  %v424_v7 = vld [vmem:[#allocation2 + $0x8] sm:$0xff] }
 0x1bc   :  { %842 = vrot.lane.b32.xlu1 %v2406_v18, %s2026_s24  ;;  %1014 = vrot.lane.b32.xlu0 %v2365_v4, %s2028_s26  ;;  %v769_v4 = vld [vmem:[#allocation2 + $0x218] sm:$0xff] }
 0x1be   :  { %v2500_v35 = vpop.permute.xlu1 %1126  ;;  %v381_v46 = vpop.permute.xlu0 %380 }
 0x1bf   :  { %3353 = vst [vmem:[#allocation27_spill] sm:$0xff] %v2500_v35  ;;  %v2530_v35 = vmul.f32 %v767_v36, %v2260_v22  ;;  %v2547_v22 = vmul.f32 %v770_v41, %v2191_v61  ;;  %v2565_v61 = vmul.f32 %v1858_v48, %v2443_v44  ;;  %v527_v41 = vld [vmem:[#allocation2 + $0xb0] sm:$0xff] }
 0x1c0   :  { %924 = vrot.lane.b32.xlu1 %v2395_v14, %s2027_s25  ;;  %1030 = vrot.lane.b32.xlu0 %v2376_v8, %s2028_s26  ;;  %v2522_v8 = vmul.f32 %v1854_v13, %v2426_v26  ;;  %v2533_v26 = vmul.f32 %v766_v34, %v2185_v57  ;;  %v2536_v13 = vmul.f32 %v768_v53, %v2189_v60  ;;  %v425_v53 = vld [vmem:[#allocation2 + $0x10] sm:$0xff] }
 0x1c1   :  { %v2550_v57 = vmul.f32 %v769_v4, %v2266_v24  ;;  %v2553_v60 = vmul.f32 %v1856_v51, %v2434_v30  ;;  %v411_v34 = vsel %vm406_vm1, %v381_v46, %v2351_v58  ;;  %v2568_v24 = vmul.f32 %v1860_v3, %v2447_v32  ;;  %v428_v30 = vld [vmem:[#allocation2 + $0x28] sm:$0xff] }
 0x1c2   :  { %v383_v39 = vpop.permute.xlu1 %382  ;;  %v2506_v40 = vpop.permute.xlu0 %396  ;;  %3354 = vst [vmem:[#allocation28_spill] sm:$0xff] %v2536_v13  ;;  %v2574_v51 = vmul.f32 %v773_v55, %v2274_v27  ;;  %v441_v48 = vmul.f32 %v425_v53, %v411_v34  ;;  %v429_v27 = vld [vmem:[#allocation2 + $0x30] sm:$0xff]  ;;  %v526_v32 = vld [vmem:[#allocation2 + $0xa8] sm:$0xff]  ;;  %v521_v53 = vld [vmem:[#allocation2 + $0x80] sm:$0xff] }
 0x1c3   :  { %3355 = vst [vmem:[#allocation29_spill] sm:$0xff] %v2550_v57  ;;  %v416_v44 = vsel %vm406_vm1, %v2349_v56, %v383_v39  ;;  %v524_v34 = vld [vmem:[#allocation2 + $0x98] sm:$0xff] }
 0x1c4   :  { %940 = vrot.lane.b32.xlu1 %v2406_v18, %s2027_s25  ;;  %1120 = vrot.lane.b32.xlu0 %v2395_v14, %s2029_s27  ;;  %3358 = vst [vmem:[#allocation32_spill] sm:$0xff] %v2574_v51 }
 0x1c6   :  { %v2512_v59 = vpop.permute.xlu1 %398  ;;  %v480_v62 = vpop.permute.xlu0 %479 }
 0x1c7   :  { %v508_v63 = vsel %vm503_vm2, %v480_v62, %v2369_v6  ;;  %v512_v38 = vsel %vm503_vm2, %v2359_v1, %v480_v62 }
 0x1c8   :  { %1022 = vrot.lane.b32.xlu1 %v2395_v14, %s2028_s26  ;;  %1136 = vrot.lane.b32.xlu0 %v2406_v18, %s2029_s27  ;;  %v771_v14 = vld [vmem:[#allocation2 + $0x228] sm:$0xff] }
 0x1c9   :  { %v2559_v36 = vmul.f32 %v771_v14, %v2268_v25  ;;  %v522_v25 = vld [vmem:[#allocation2 + $0x88] sm:$0xff]  ;;  %v523_v14 = vld [vmem:[#allocation2 + $0x90] sm:$0xff] }
 0x1ca   :  { %v482_v17 = vpop.permute.xlu1 %481  ;;  %v496_v31 = vpop.permute.xlu0 %495  ;;  %v538_v51 = vmul.f32 %v522_v25, %v512_v38  ;;  %v539_v43 = vmul.f32 %v523_v14, %v508_v63  ;;  %v620_v63 = vld [vmem:[#allocation2 + $0x108] sm:$0xff] }
 0x1cb   :  { %3356 = vst [vmem:[#allocation30_spill] sm:$0xff] %v2559_v36  ;;  %v513_v55 = vsel %vm503_vm2, %v2367_v5, %v482_v17  ;;  %v509_v62 = vsel %vm503_vm2, %v482_v17, %v2378_v9  ;;  %v516_v50 = vsel %vm503_vm2, %v496_v31, %v2359_v1  ;;  %v420_v17 = vsel %vm406_vm1, %v2512_v59, %v2349_v56  ;;  %v430_v1 = vld [vmem:[#allocation2 + $0x38] sm:$0xff] }
 0x1cc   :  { %1038 = vrot.lane.b32.xlu1 %v2406_v18, %s2028_s26  ;;  %378 = vrot.lane.b32.xlu0 %v2522_v8, %s2022_s1  ;;  %v415_v18 = vsel %vm406_vm1, %v2343_v54, %v381_v46  ;;  %v407_v46 = vsel %vm406_vm1, %v2351_v58, %v2506_v40  ;;  %v419_v58 = vsel %vm406_vm1, %v2506_v40, %v2343_v54  ;;  %v525_v54 = vld [vmem:[#allocation2 + $0xa0] sm:$0xff] }
 0x1cd   :  { %v440_v4 = vmul.f32 %v424_v7, %v415_v18  ;;  %v412_v18 = vsel %vm406_vm1, %v383_v39, %v2357_v0  ;;  %v504_v39 = vsel %vm503_vm2, %v2369_v6, %v496_v31  ;;  %v444_v6 = vmul.f32 %v428_v30, %v416_v44 }
 0x1ce   :  { %v2542_v49 = vpop.permute.xlu1 %497  ;;  %v2544_v52 = vpop.permute.xlu0 %577  ;;  %v408_v31 = vsel %vm406_vm1, %v2357_v0, %v2512_v59  ;;  %v542_v45 = vmul.f32 %v526_v32, %v513_v55  ;;  %v543_v56 = vmul.f32 %v527_v41, %v509_v62  ;;  %v537_v25 = vmul.f32 %v521_v53, %v516_v50  ;;  %v528_v41 = vld [vmem:[#allocation2 + $0xb8] sm:$0xff]  ;;  %v621_v53 = vld [vmem:[#allocation2 + $0x110] sm:$0xff] }
 0x1cf   :  { %v517_v40 = vsel %vm503_vm2, %v2542_v49, %v2367_v5  ;;  %v540_v14 = vmul.f32 %v524_v34, %v504_v39  ;;  %v610_v38 = vsel %vm601_vm3, %v2380_v10, %v2544_v52  ;;  %v445_v30 = vmul.f32 %v429_v27, %v412_v18  ;;  %v718_v39 = vld [vmem:[#allocation2 + $0x188] sm:$0xff] }
 0x1d0   :  { %1016 = vrot.lane.b32.xlu1 %v2522_v8, %s2028_s26  ;;  %394 = vrot.lane.b32.xlu0 %v2553_v60, %s2022_s1  ;;  %v439_v44 = vmul.f32 %v423_v42, %v419_v58  ;;  %v442_v32 = vmul.f32 %v426_v37, %v407_v46  ;;  %v443_v55 = vmul.f32 %v427_v47, %v420_v17  ;;  %v622_v46 = vld [vmem:[#allocation2 + $0x118] sm:$0xff] }
 0x1d1   :  { %v446_v57 = vmul.f32 %v430_v1, %v408_v31  ;;  %v554_v5 = vadd.f32 %v538_v51, %v440_v4  ;;  %v555_v36 = vadd.f32 %v539_v43, %v441_v48  ;;  %v541_v13 = vmul.f32 %v525_v54, %v517_v40  ;;  %v624_v51 = vld [vmem:[#allocation2 + $0x128] sm:$0xff]  ;;  %v619_v4 = vld [vmem:[#allocation2 + $0x100] sm:$0xff]  ;;  %v626_v40 = vld [vmem:[#allocation2 + $0x138] sm:$0xff] }
 0x1d2   :  { %v580_v3 = vpop.permute.xlu1 %579  ;;  %v594_v7 = vpop.permute.xlu0 %593  ;;  %v2633_v50 = vadd.f32 %v542_v45, %v444_v6  ;;  %v505_v62 = vsel %vm503_vm2, %v2378_v9, %v2542_v49  ;;  %v606_v37 = vsel %vm601_vm3, %v2544_v52, %v2388_v12  ;;  %v636_v47 = vmul.f32 %v620_v63, %v610_v38  ;;  %v625_v52 = vld [vmem:[#allocation2 + $0x130] sm:$0xff]  ;;  %v623_v1 = vld [vmem:[#allocation2 + $0x120] sm:$0xff] }
 0x1d3   :  { %v2645_v42 = vadd.f32 %v543_v56, %v445_v30  ;;  %v553_v45 = vadd.f32 %v537_v25, %v439_v44  ;;  %v2647_v43 = vadd.f32 %v540_v14, %v442_v32  ;;  %v614_v9 = vsel %vm601_vm3, %v594_v7, %v2380_v10  ;;  %v721_v63 = vld [vmem:[#allocation2 + $0x1a0] sm:$0xff]  ;;  %v719_v32 = vld [vmem:[#allocation2 + $0x190] sm:$0xff] }
 0x1d4   :  { %1032 = vrot.lane.b32.xlu1 %v2553_v60, %s2028_s26  ;;  %477 = vrot.lane.b32.xlu0 %v2522_v8, %s2023_s4  ;;  %v607_v27 = vsel %vm601_vm3, %v580_v3, %v2397_v15  ;;  %v611_v18 = vsel %vm601_vm3, %v2386_v11, %v580_v3  ;;  %v602_v34 = vsel %vm601_vm3, %v2388_v12, %v594_v7  ;;  %v717_v7 = vld [vmem:[#allocation2 + $0x180] sm:$0xff] }
 0x1d5   :  { %v544_v58 = vmul.f32 %v528_v41, %v505_v62  ;;  %v557_v17 = vadd.f32 %v541_v13, %v443_v55  ;;  %v637_v6 = vmul.f32 %v621_v53, %v606_v37  ;;  %v652_v3 = vadd.f32 %v636_v47, %v554_v5  ;;  %v723_v41 = vld [vmem:[#allocation2 + $0x1b0] sm:$0xff]  ;;  %v720_v53 = vld [vmem:[#allocation2 + $0x198] sm:$0xff] }
 0x1d6   :  { %v596_v0 = vpop.permute.xlu1 %595  ;;  %v676_v59 = vpop.permute.xlu0 %675  ;;  %v635_v54 = vmul.f32 %v619_v4, %v614_v9  ;;  %v640_v56 = vmul.f32 %v624_v51, %v611_v18  ;;  %v638_v25 = vmul.f32 %v622_v46, %v602_v34 }
 0x1d7   :  { %v708_v10 = vsel %vm699_vm4, %v2399_v16, %v676_v59  ;;  %v615_v31 = vsel %vm601_vm3, %v596_v0, %v2386_v11  ;;  %v603_v12 = vsel %vm601_vm3, %v2397_v15, %v596_v0  ;;  %v641_v11 = vmul.f32 %v625_v52, %v607_v27  ;;  %v722_v0 = vld [vmem:[#allocation2 + $0x1a8] sm:$0xff]  ;;  %v724_v27 = vld [vmem:[#allocation2 + $0x1b8] sm:$0xff] }
 0x1d8   :  { %386 = vrot.lane.b32.xlu1 %v2565_v61, %s2022_s1  ;;  %493 = vrot.lane.b32.xlu0 %v2553_v60, %s2023_s4  ;;  %v734_v14 = vmul.f32 %v718_v39, %v708_v10  ;;  %v639_v44 = vmul.f32 %v623_v1, %v615_v31  ;;  %v704_v15 = vsel %vm699_vm4, %v676_v59, %v2410_v20  ;;  %v864_v31 = vld [vmem:[#allocation2 + $0x280] sm:$0xff] }
 0x1d9   :  { %v642_v5 = vmul.f32 %v626_v40, %v603_v12  ;;  %v560_v47 = vadd.f32 %v544_v58, %v446_v57  ;;  %v653_v51 = vadd.f32 %v637_v6, %v555_v36  ;;  %v735_v9 = vmul.f32 %v719_v32, %v704_v15 }
 0x1da   :  { %v678_v49 = vpop.permute.xlu1 %677  ;;  %v692_v48 = vpop.permute.xlu0 %691  ;;  %v656_v46 = vadd.f32 %v640_v56, %v2633_v50  ;;  %v655_v34 = vadd.f32 %v639_v44, %v557_v17  ;;  %v654_v39 = vadd.f32 %v638_v25, %v2647_v43  ;;  %v867_v44 = vld [vmem:[#allocation2 + $0x298] sm:$0xff] }
 0x1db   :  { %v712_v13 = vsel %vm699_vm4, %v692_v48, %v2399_v16  ;;  %v709_v16 = vsel %vm699_vm4, %v2408_v19, %v678_v49  ;;  %v705_v62 = vsel %vm699_vm4, %v678_v49, %v2416_v21  ;;  %v700_v59 = vsel %vm699_vm4, %v2410_v20, %v692_v48 }
 0x1dc   :  { %402 = vrot.lane.b32.xlu1 %v2568_v24, %s2022_s1  ;;  %575 = vrot.lane.b32.xlu0 %v2522_v8, %s2024_s22  ;;  %v733_v37 = vmul.f32 %v717_v7, %v712_v13  ;;  %v750_v49 = vadd.f32 %v734_v14, %v652_v3  ;;  %v738_v52 = vmul.f32 %v722_v0, %v709_v16  ;;  %v866_v14 = vld [vmem:[#allocation2 + $0x290] sm:$0xff] }
 0x1dd   :  { %v739_v57 = vmul.f32 %v723_v41, %v705_v62  ;;  %v736_v36 = vmul.f32 %v720_v53, %v700_v59  ;;  %v658_v10 = vadd.f32 %v642_v5, %v560_v47  ;;  %v3359_v5 = vld [vmem:[#allocation28_spill] sm:$0xff] }
 0x1de   :  { %v694_v38 = vpop.permute.xlu1 %693  ;;  %v823_v30 = vpop.permute.xlu0 %822  ;;  %v754_v43 = vadd.f32 %v738_v52, %v656_v46  ;;  %v799_v3 = vadd.f32 %v2530_v35, %v750_v49  ;;  %v3364_v46 = vld [vmem:[#allocation32_spill] sm:$0xff] }
 0x1df   :  { %v713_v55 = vsel %vm699_vm4, %v694_v38, %v2408_v19  ;;  %v651_v19 = vadd.f32 %v635_v54, %v553_v45  ;;  %v701_v20 = vsel %vm699_vm4, %v2416_v21, %v694_v38  ;;  %v657_v45 = vadd.f32 %v641_v11, %v2645_v42  ;;  %v865_v21 = vld [vmem:[#allocation2 + $0x288] sm:$0xff]  ;;  %v868_v54 = vld [vmem:[#allocation2 + $0x2a0] sm:$0xff] }
 0x1e0   :  { %485 = vrot.lane.b32.xlu1 %v2565_v61, %s2023_s4  ;;  %v737_v4 = vmul.f32 %v721_v63, %v713_v55  ;;  %591 = vrot.lane.b32.xlu0 %v2553_v60, %s2024_s22  ;;  %v740_v6 = vmul.f32 %v724_v27, %v701_v20  ;;  %v851_v50 = vsel %vm846_vm5, %v823_v30, %v2430_v29  ;;  %v869_v11 = vld [vmem:[#allocation2 + $0x2a8] sm:$0xff]  ;;  %v870_v55 = vld [vmem:[#allocation2 + $0x2b0] sm:$0xff]  ;;  %v3363_v20 = vld [vmem:[#allocation31_spill] sm:$0xff] }
 0x1e1   :  { %v749_v58 = vadd.f32 %v733_v37, %v651_v19  ;;  %v855_v17 = vsel %vm846_vm5, %v2418_v23, %v823_v30  ;;  %v751_v42 = vadd.f32 %v735_v9, %v653_v51  ;;  %v755_v13 = vadd.f32 %v739_v57, %v657_v45  ;;  %v3360_v37 = vld [vmem:[#allocation30_spill] sm:$0xff]  ;;  %v3361_v51 = vld [vmem:[#allocation29_spill] sm:$0xff]  ;;  %v3362_v9 = vld [vmem:[#allocation16_spill] sm:$0xff] }
 0x1e2   :  { %v825_v48 = vpop.permute.xlu1 %824  ;;  %v839_v18 = vpop.permute.xlu0 %838  ;;  %v753_v1 = vadd.f32 %v737_v4, %v655_v34  ;;  %v752_v56 = vadd.f32 %v736_v36, %v654_v39  ;;  %v880_v38 = vmul.f32 %v864_v31, %v855_v17  ;;  %v881_v30 = vmul.f32 %v865_v21, %v851_v50  ;;  %v963_v36 = vld [vmem:[#allocation2 + $0x308] sm:$0xff]  ;;  %v3365_v45 = vld [vmem:[#allocation18_spill] sm:$0xff] }
 0x1e3   :  { %v856_v40 = vsel %vm846_vm5, %v2428_v28, %v825_v48  ;;  %v852_v25 = vsel %vm846_vm5, %v825_v48, %v2449_v33  ;;  %v847_v35 = vsel %vm846_vm5, %v2430_v29, %v839_v18  ;;  %v798_v63 = vadd.f32 %v2533_v26, %v749_v58  ;;  %v3366_v31 = vld [vmem:[#allocation17_spill] sm:$0xff] }
 0x1e4   :  { %501 = vrot.lane.b32.xlu1 %v2568_v24, %s2023_s4  ;;  %673 = vrot.lane.b32.xlu0 %v2522_v8, %s2025_s23  ;;  %v859_v32 = vsel %vm846_vm5, %v839_v18, %v2418_v23  ;;  %v756_v15 = vadd.f32 %v740_v6, %v658_v10  ;;  %v802_v0 = vadd.f32 %v2547_v22, %v753_v1  ;;  %v871_v23 = vld [vmem:[#allocation2 + $0x2b8] sm:$0xff]  ;;  %v966_v1 = vld [vmem:[#allocation2 + $0x320] sm:$0xff] }
 0x1e5   :  { %v884_v16 = vmul.f32 %v868_v54, %v856_v40  ;;  %v885_v26 = vmul.f32 %v869_v11, %v852_v25  ;;  %v800_v41 = vadd.f32 %v3359_v5, %v751_v42  ;;  %v882_v62 = vmul.f32 %v866_v14, %v847_v35  ;;  %v964_v40 = vld [vmem:[#allocation2 + $0x310] sm:$0xff]  ;;  %v969_v14 = vld [vmem:[#allocation2 + $0x338] sm:$0xff] }
 0x1e6   :  { %v841_v12 = vpop.permute.xlu1 %840  ;;  %v921_v7 = vpop.permute.xlu0 %920  ;;  %v803_v47 = vadd.f32 %v3360_v37, %v754_v43  ;;  %v801_v19 = vadd.f32 %v3361_v51, %v752_v56  ;;  %v883_v4 = vmul.f32 %v867_v44, %v859_v32  ;;  %v896_v52 = vadd.f32 %v880_v38, %v798_v63  ;;  %v967_v43 = vld [vmem:[#allocation2 + $0x328] sm:$0xff]  ;;  %v968_v25 = vld [vmem:[#allocation2 + $0x330] sm:$0xff]  ;;  %v1060_v44 = vld [vmem:[#allocation2 + $0x380] sm:$0xff] }
 0x1e7   :  { %v848_v29 = vsel %vm846_vm5, %v2449_v33, %v841_v12  ;;  %v860_v53 = vsel %vm846_vm5, %v841_v12, %v2428_v28  ;;  %v962_v33 = vld [vmem:[#allocation2 + $0x300] sm:$0xff]  ;;  %v953_v49 = vsel %vm944_vm6, %v3362_v9, %v921_v7  ;;  %v897_v27 = vadd.f32 %v881_v30, %v799_v3  ;;  %v3367_v3 = vld [vmem:[#allocation19_spill] sm:$0xff]  ;;  %v1061_v32 = vld [vmem:[#allocation2 + $0x388] sm:$0xff] }
 0x1e8   :  { %583 = vrot.lane.b32.xlu1 %v2565_v61, %s2024_s22  ;;  %689 = vrot.lane.b32.xlu0 %v2553_v60, %s2025_s23  ;;  %v804_v48 = vadd.f32 %v3363_v20, %v755_v13  ;;  %v886_v18 = vmul.f32 %v870_v55, %v848_v29  ;;  %v900_v28 = vadd.f32 %v884_v16, %v802_v0  ;;  %v965_v12 = vld [vmem:[#allocation2 + $0x318] sm:$0xff]  ;;  %v3369_v16 = vld [vmem:[#allocation20_spill] sm:$0xff] }
 0x1e9   :  { %v805_v34 = vadd.f32 %v3364_v46, %v756_v15  ;;  %v887_v57 = vmul.f32 %v871_v23, %v860_v53  ;;  %v949_v39 = vsel %vm944_vm6, %v921_v7, %v3365_v45  ;;  %v901_v10 = vadd.f32 %v885_v26, %v803_v47  ;;  %v3368_v15 = vld [vmem:[#allocation22_spill] sm:$0xff]  ;;  %v1065_v23 = vld [vmem:[#allocation2 + $0x3a8] sm:$0xff]  ;;  %v3370_v47 = vld [vmem:[#allocation23_spill] sm:$0xff] }
 0x1ea   :  { %v923_v59 = vpop.permute.xlu1 %922  ;;  %v937_v22 = vpop.permute.xlu0 %936  ;;  %v898_v58 = vadd.f32 %v882_v62, %v800_v41  ;;  %v978_v6 = vmul.f32 %v962_v33, %v953_v49  ;;  %v899_v42 = vadd.f32 %v883_v4, %v801_v19  ;;  %v902_v56 = vadd.f32 %v886_v18, %v804_v48  ;;  %v1064_v62 = vld [vmem:[#allocation2 + $0x3a0] sm:$0xff]  ;;  %v3371_v19 = vld [vmem:[#allocation21_spill] sm:$0xff]  ;;  %v1062_v33 = vld [vmem:[#allocation2 + $0x390] sm:$0xff] }
 0x1eb   :  { %v954_v21 = vsel %vm944_vm6, %v3366_v31, %v923_v59  ;;  %v950_v54 = vsel %vm944_vm6, %v923_v59, %v3367_v3  ;;  %v945_v7 = vsel %vm944_vm6, %v3365_v45, %v937_v22  ;;  %v957_v13 = vsel %vm944_vm6, %v937_v22, %v3362_v9  ;;  %v1063_v9 = vld [vmem:[#allocation2 + $0x398] sm:$0xff] }
 0x1ec   :  { %599 = vrot.lane.b32.xlu1 %v2568_v24, %s2024_s22  ;;  %820 = vrot.lane.b32.xlu0 %v2522_v8, %s2026_s24  ;;  %v979_v11 = vmul.f32 %v963_v36, %v949_v39  ;;  %v903_v38 = vadd.f32 %v887_v57, %v805_v34  ;;  %v982_v30 = vmul.f32 %v966_v1, %v954_v21  ;;  %v1159_v21 = vld [vmem:[#allocation2 + $0x408] sm:$0xff] }
 0x1ed   :  { %v994_v29 = vadd.f32 %v978_v6, %v896_v52  ;;  %v983_v26 = vmul.f32 %v967_v43, %v950_v54  ;;  %v980_v5 = vmul.f32 %v964_v40, %v945_v7  ;;  %v981_v41 = vmul.f32 %v965_v12, %v957_v13  ;;  %v1066_v54 = vld [vmem:[#allocation2 + $0x3b0] sm:$0xff] }
 0x1ee   :  { %v939_v50 = vpop.permute.xlu1 %938  ;;  %v1019_v17 = vpop.permute.xlu0 %1018  ;;  %v995_v18 = vadd.f32 %v979_v11, %v897_v27  ;;  %v998_v46 = vadd.f32 %v982_v30, %v900_v28  ;;  %v3372_v12 = vld [vmem:[#allocation26_spill] sm:$0xff] }
 0x1ef   :  { %v946_v35 = vsel %vm944_vm6, %v3367_v3, %v939_v50  ;;  %v958_v63 = vsel %vm944_vm6, %v939_v50, %v3366_v31  ;;  %v1047_v0 = vsel %vm1042_vm7, %v1019_v17, %v3368_v15  ;;  %v1051_v55 = vsel %vm1042_vm7, %v3369_v16, %v1019_v17  ;;  %v1158_v31 = vld [vmem:[#allocation2 + $0x400] sm:$0xff] }
 0x1f0   :  { %681 = vrot.lane.b32.xlu1 %v2565_v61, %s2025_s23  ;;  %836 = vrot.lane.b32.xlu0 %v2553_v60, %s2026_s24  ;;  %v984_v22 = vmul.f32 %v968_v25, %v946_v35  ;;  %v985_v37 = vmul.f32 %v969_v14, %v958_v63  ;;  %v1076_v49 = vmul.f32 %v1060_v44, %v1051_v55  ;;  %v1162_v25 = vld [vmem:[#allocation2 + $0x420] sm:$0xff]  ;;  %v1163_v14 = vld [vmem:[#allocation2 + $0x428] sm:$0xff] }
 0x1f1   :  { %v1077_v52 = vmul.f32 %v1061_v32, %v1047_v0  ;;  %v999_v36 = vadd.f32 %v983_v26, %v901_v10  ;;  %v996_v45 = vadd.f32 %v980_v5, %v898_v58  ;;  %v997_v17 = vadd.f32 %v981_v41, %v899_v42  ;;  %v3373_v58 = vld [vmem:[#allocation24_spill] sm:$0xff]  ;;  %v1160_v32 = vld [vmem:[#allocation2 + $0x410] sm:$0xff]  ;;  %v3374_v26 = vld [vmem:[#allocation27_spill] sm:$0xff] }
 0x1f2   :  { %v1021_v53 = vpop.permute.xlu1 %1020  ;;  %v1035_v59 = vpop.permute.xlu0 %1034  ;;  %v1000_v43 = vadd.f32 %v984_v22, %v902_v56  ;;  %v2800_v3 = vadd.f32 %v985_v37, %v903_v38  ;;  %v1092_v28 = vadd.f32 %v1076_v49, %v994_v29  ;;  %v3375_v41 = vld [vmem:[#allocation25_spill] sm:$0xff]  ;;  %v3376_v37 = vld [vmem:[#allocation8_spill] sm:$0xff] }
 0x1f3   :  { %v1048_v51 = vsel %vm1042_vm7, %v1021_v53, %v3370_v47  ;;  %v1052_v4 = vsel %vm1042_vm7, %v3371_v19, %v1021_v53  ;;  %v1043_v20 = vsel %vm1042_vm7, %v3368_v15, %v1035_v59  ;;  %v1055_v48 = vsel %vm1042_vm7, %v1035_v59, %v3369_v16  ;;  %v1161_v15 = vld [vmem:[#allocation2 + $0x418] sm:$0xff] }
 0x1f4   :  { %697 = vrot.lane.b32.xlu1 %v2568_v24, %s2025_s23  ;;  %v1080_v34 = vmul.f32 %v1064_v62, %v1052_v4  ;;  %v1081_v57 = vmul.f32 %v1065_v23, %v1048_v51  ;;  %918 = vrot.lane.b32.xlu0 %v2522_v8, %s2027_s25  ;;  %v1078_v39 = vmul.f32 %v1062_v33, %v1043_v20  ;;  %v1067_v16 = vld [vmem:[#allocation2 + $0x3b8] sm:$0xff] }
 0x1f5   :  { %v1079_v6 = vmul.f32 %v1063_v9, %v1055_v48  ;;  %v1093_v40 = vadd.f32 %v1077_v52, %v995_v18 }
 0x1f6   :  { %v1037_v1 = vpop.permute.xlu1 %1036  ;;  %v1117_v50 = vpop.permute.xlu0 %1116  ;;  %v1096_v42 = vadd.f32 %v1080_v34, %v998_v46  ;;  %v1097_v13 = vadd.f32 %v1081_v57, %v999_v36  ;;  %v1094_v35 = vadd.f32 %v1078_v39, %v996_v45  ;;  %v1164_v36 = vld [vmem:[#allocation2 + $0x430] sm:$0xff]  ;;  %v1165_v45 = vld [vmem:[#allocation2 + $0x438] sm:$0xff]  ;;  %v3377_v39 = vld [vmem:[#allocation9_spill] sm:$0xff] }
 0x1f7   :  { %v1044_v27 = vsel %vm1042_vm7, %v3370_v47, %v1037_v1  ;;  %v1145_v10 = vsel %vm1140_vm8, %v1117_v50, %v3372_v12  ;;  %v1149_v7 = vsel %vm1140_vm8, %v3373_v58, %v1117_v50  ;;  %v1095_v63 = vadd.f32 %v1079_v6, %v997_v17 }
 0x1f8   :  { %828 = vrot.lane.b32.xlu1 %v2565_v61, %s2026_s24  ;;  %v1174_v56 = vmul.f32 %v1158_v31, %v1149_v7  ;;  %v1175_v11 = vmul.f32 %v1159_v21, %v1145_v10  ;;  %934 = vrot.lane.b32.xlu0 %v2553_v60, %s2027_s25  ;;  %v1056_v38 = vsel %vm1042_vm7, %v1037_v1, %v3371_v19 }
 0x1f9   :  { %v1082_v30 = vmul.f32 %v1066_v54, %v1044_v27  ;;  %v1083_v33 = vmul.f32 %v1067_v16, %v1056_v38 }
 0x1fa   :  { %v1119_v44 = vpop.permute.xlu1 %1118  ;;  %v1133_v0 = vpop.permute.xlu0 %1132  ;;  %v1190_v55 = vadd.f32 %v1174_v56, %v1092_v28  ;;  %v1191_v29 = vadd.f32 %v1175_v11, %v1093_v40 }
 0x1fb   :  { %v1146_v5 = vsel %vm1140_vm8, %v1119_v44, %v3374_v26  ;;  %v1150_v62 = vsel %vm1140_vm8, %v3375_v41, %v1119_v44  ;;  %v1141_v59 = vsel %vm1140_vm8, %v3372_v12, %v1133_v0  ;;  %v1153_v22 = vsel %vm1140_vm8, %v1133_v0, %v3373_v58 }
 0x1fc   :  { %v1178_v23 = vmul.f32 %v1162_v25, %v1150_v62  ;;  %v1179_v53 = vmul.f32 %v1163_v14, %v1146_v5  ;;  %844 = vrot.lane.b32.xlu1 %v2568_v24, %s2026_s24  ;;  %v2833_v47 = vadd.f32 %v3376_v37, %v1190_v55  ;;  %v2836_v51 = vadd.f32 %v3376_v37, %v1191_v29 }
 0x1fd   :  { %v1176_v19 = vmul.f32 %v1160_v32, %v1141_v59  ;;  %v1177_v4 = vmul.f32 %v1161_v15, %v1153_v22  ;;  %1114 = vrot.lane.b32.xlu0 %v2522_v8, %s2029_s27  ;;  %v1098_v9 = vadd.f32 %v1082_v30, %v1000_v43  ;;  %v1099_v7 = vadd.f32 %v1083_v33, %v2800_v3 }
 0x1fe   :  { %v1194_v49 = vadd.f32 %v1178_v23, %v1096_v42  ;;  %v1195_v52 = vadd.f32 %v1179_v53, %v1097_v13  ;;  %v1135_v20 = vpop.permute.xlu1 %1134  ;;  %v2840_v48 = vpop.permute.xlu0 %376  ;;  %v1246_v18 = vsub.f32 0.0, %v2833_v47  ;;  %v1247_v46 = vsub.f32 0.0, %v2836_v51 }
 0x1ff   :  { %v1192_v34 = vadd.f32 %v1176_v19, %v1094_v35  ;;  %v1193_v57 = vadd.f32 %v1177_v4, %v1095_v63  ;;  %v1142_v31 = vsel %vm1140_vm8, %v3374_v26, %v1135_v20  ;;  %v1154_v21 = vsel %vm1140_vm8, %v1135_v20, %v3375_v41 }
 0x200   :  { %v2845_v6 = vadd.f32 %v3377_v39, %v1194_v49  ;;  %v2848_v1 = vadd.f32 %v3377_v39, %v1195_v52  ;;  %926 = vrot.lane.b32.xlu1 %v2565_v61, %s2027_s25  ;;  %v1262_v50 = vmul.f32 1.442695, %v1246_v18  ;;  %v1264_v17 = vmul.f32 1.442695, %v1247_v46 }
 0x201   :  { %v2859_v43 = vadd.f32 %v3376_v37, %v1192_v34  ;;  %v2862_v54 = vadd.f32 %v3376_v37, %v1193_v57  ;;  %1024 = vrot.lane.b32.xlu0 %v2565_v61, %s2028_s26  ;;  %v1180_v40 = vmul.f32 %v1164_v36, %v1142_v31  ;;  %v1181_v12 = vmul.f32 %v1165_v45, %v1154_v21 }
 0x202   :  { %v1250_v27 = vsub.f32 0.0, %v2845_v6  ;;  %v1251_v28 = vsub.f32 0.0, %v2848_v1  ;;  %v2868_v10 = vpop.permute.xlu1 %1112  ;;  %v2870_v58 = vpop.permute.xlu0 %392  ;;  %1861 = vpow2.f32 %v1262_v50 }
 0x203   :  { %v1248_v42 = vsub.f32 0.0, %v2859_v43  ;;  %v1249_v13 = vsub.f32 0.0, %v2862_v54  ;;  %1863 = vpow2.f32 %v1264_v17  ;;  %v1196_v11 = vadd.f32 %v1180_v40, %v1098_v9 }
 0x204   :  { %v1270_v56 = vmul.f32 1.442695, %v1250_v27  ;;  %942 = vrot.lane.b32.xlu1 %v2568_v24, %s2027_s25  ;;  %v1197_v35 = vadd.f32 %v1181_v12, %v1099_v7  ;;  %v1272_v63 = vmul.f32 1.442695, %v1251_v28 }
 0x205   :  { %v1266_v25 = vmul.f32 1.442695, %v1248_v42  ;;  %v1268_v14 = vmul.f32 1.442695, %v1249_v13  ;;  %1040 = vrot.lane.b32.xlu0 %v2568_v24, %s2028_s26  ;;  %v2880_v3 = vadd.f32 %v3377_v39, %v1196_v11  ;;  %v432_v11 = vld [vmem:[#allocation2 + $0x48] sm:$0xff] }
 0x206   :  { %v2882_v38 = vpop.permute.xlu1 %1128  ;;  %v2884_v30 = vpop.permute.xlu0 %475  ;;  %1865 = vpow2.f32 %v1270_v56  ;;  %v2887_v44 = vadd.f32 %v3377_v39, %v1197_v35 }
 0x207   :  { %1867 = vpow2.f32 %v1266_v25  ;;  %v1252_v32 = vsub.f32 0.0, %v2880_v3  ;;  %v433_v25 = vld [vmem:[#allocation2 + $0x50] sm:$0xff] }
 0x208   :  { %1122 = vrot.lane.b32.xlu1 %v2565_v61, %s2029_s27  ;;  %1869 = vpow2.f32 %v1268_v14  ;;  %v1253_v15 = vsub.f32 0.0, %v2887_v44 }
 0x209   :  { %1130 = vrot.lane.b32.xlu0 %v2553_v60, %s2029_s27  ;;  %1871 = vpow2.f32 %v1272_v63  ;;  %v1274_v0 = vmul.f32 1.442695, %v1252_v32  ;;  %v431_v63 = vld [vmem:[#allocation2 + $0x40] sm:$0xff] }
 0x20a   :  { %v385_v16 = vpop.permute.xlu1 %384  ;;  %v2895_v55 = vpop.permute.xlu0 %491  ;;  %v1276_v29 = vmul.f32 1.442695, %v1253_v15  ;;  %v529_v15 = vld [vmem:[#allocation2 + $0xc0] sm:$0xff] }
 0x20b   :  { %1873 = vpow2.f32 %v1274_v0  ;;  %v413_v14 = vsel %vm406_vm1, %v385_v16, %v2870_v58  ;;  %v417_v35 = vsel %vm406_vm1, %v2840_v48, %v385_v16 }
 0x20c   :  { %1138 = vrot.lane.b32.xlu1 %v2568_v24, %s2029_s27  ;;  %v1862_v26 = vpop.eup %1861  ;;  %1875 = vpow2.f32 %v1276_v29 }
 0x20d   :  { %v1864_v5 = vpop.eup %1863  ;;  %v1294_v23 = vadd.f32 1.0, %v1862_v26 }
 0x20e   :  { %v401_v41 = vpop.permute.xlu1 %400  ;;  %v2899_v62 = vpop.permute.xlu0 %573  ;;  %v1295_v59 = vadd.f32 1.0, %v1864_v5 }
 0x20f   :  { %1877 = vrcp.f32 %v1294_v23 }
 0x210   :  { %v1866_v53 = vpop.eup %1865  ;;  %1879 = vrcp.f32 %v1295_v59  ;;  %v449_v59 = vmul.f32 %v433_v25, %v413_v14 }
 0x211   :  { %v1868_v22 = vpop.eup %1867  ;;  %v1298_v20 = vadd.f32 1.0, %v1866_v53  ;;  %v448_v53 = vmul.f32 %v432_v11, %v417_v35  ;;  %v630_v35 = vld [vmem:[#allocation2 + $0x158] sm:$0xff] }
 0x212   :  { %v484_v37 = vpop.permute.xlu1 %483  ;;  %v2901_v19 = vpop.permute.xlu0 %589  ;;  %v1296_v9 = vadd.f32 1.0, %v1868_v22  ;;  %v409_v22 = vsel %vm406_vm1, %v2870_v58, %v401_v41 }
 0x213   :  { %v1870_v4 = vpop.eup %1869 }
 0x214   :  { %v1872_v33 = vpop.eup %1871  ;;  %v1297_v49 = vadd.f32 1.0, %v1870_v4  ;;  %1881 = vrcp.f32 %v1296_v9  ;;  %v530_v9 = vld [vmem:[#allocation2 + $0xc8] sm:$0xff] }
 0x215   :  { %v1874_v52 = vpop.eup %1873  ;;  %v1299_v57 = vadd.f32 1.0, %v1872_v33  ;;  %v434_v33 = vld [vmem:[#allocation2 + $0x58] sm:$0xff] }
 0x216   :  { %v500_v18 = vpop.permute.xlu1 %499  ;;  %v2903_v46 = vpop.permute.xlu0 %671  ;;  %v1300_v36 = vadd.f32 1.0, %v1874_v52  ;;  %1883 = vrcp.f32 %v1297_v49  ;;  %v510_v49 = vsel %vm503_vm2, %v484_v37, %v2895_v55  ;;  %v627_v52 = vld [vmem:[#allocation2 + $0x140] sm:$0xff] }
 0x217   :  { %v1876_v34 = vpop.eup %1875  ;;  %1885 = vrcp.f32 %v1298_v20  ;;  %v518_v0 = vsel %vm503_vm2, %v500_v18, %v2884_v30  ;;  %v532_v20 = vld [vmem:[#allocation2 + $0xd8] sm:$0xff] }
 0x218   :  { %v1301_v45 = vadd.f32 1.0, %v1876_v34  ;;  %1887 = vrcp.f32 %v1299_v57  ;;  %v545_v34 = vmul.f32 %v529_v15, %v518_v0 }
 0x219   :  { %1889 = vrcp.f32 %v1300_v36  ;;  %v1878_v21 = vpop.eup %1877 }
 0x21a   :  { %v582_v39 = vpop.permute.xlu1 %581  ;;  %v2905_v31 = vpop.permute.xlu0 %687  ;;  %1891 = vrcp.f32 %v1301_v45  ;;  %v2914_v7 = vmul.f32 %v1878_v21, %v2833_v47  ;;  %v421_v47 = vsel %vm406_vm1, %v401_v41, %v2840_v48  ;;  %v531_v41 = vld [vmem:[#allocation2 + $0xd0] sm:$0xff] }
 0x21b   :  { %v1880_v27 = vpop.eup %1879  ;;  %v447_v4 = vmul.f32 %v431_v63, %v421_v47  ;;  %v612_v57 = vsel %vm601_vm3, %v2899_v62, %v582_v39  ;;  %v547_v25 = vmul.f32 %v531_v41, %v510_v49  ;;  %v774_v49 = vld [vmem:[#allocation2 + $0x240] sm:$0xff]  ;;  %v775_v41 = vld [vmem:[#allocation2 + $0x248] sm:$0xff] }
 0x21c   :  { %v2917_v42 = vmul.f32 %v1880_v27, %v2836_v51 }
 0x21d   :  { %v561_v47 = vadd.f32 %v545_v34, %v447_v4  ;;  %v3378_v34 = vld [vmem:[#allocation12_spill] sm:$0xff] }
 0x21e   :  { %v598_v50 = vpop.permute.xlu1 %597  ;;  %v2907_v17 = vpop.permute.xlu0 %818  ;;  %v1342_v5 = vadd.f32 %v2917_v42, %v2914_v7 }
 0x21f   :  { %v1882_v28 = vpop.eup %1881  ;;  %v616_v58 = vsel %vm601_vm3, %v598_v50, %v2899_v62  ;;  %v604_v63 = vsel %vm601_vm3, %v2901_v19, %v598_v50 }
 0x220   :  { %v1884_v13 = vpop.eup %1883  ;;  %v2936_v16 = vmul.f32 %v1882_v28, %v2859_v43  ;;  %v514_v43 = vsel %vm503_vm2, %v2884_v30, %v484_v37  ;;  %v725_v37 = vld [vmem:[#allocation2 + $0x1c0] sm:$0xff]  ;;  %v643_v11 = vmul.f32 %v627_v52, %v616_v58 }
 0x221   :  { %v1886_v56 = vpop.eup %1885  ;;  %v2939_v23 = vmul.f32 %v1884_v13, %v2862_v54  ;;  %v506_v54 = vsel %vm503_vm2, %v2895_v55, %v500_v18  ;;  %v628_v55 = vld [vmem:[#allocation2 + $0x148] sm:$0xff]  ;;  %v546_v28 = vmul.f32 %v530_v9, %v514_v43  ;;  %v629_v13 = vld [vmem:[#allocation2 + $0x150] sm:$0xff]  ;;  %v563_v43 = vadd.f32 %v547_v25, %v449_v59 }
 0x222   :  { %v2909_v40 = vpop.permute.xlu1 %679  ;;  %v2911_v12 = vpop.permute.xlu0 %834  ;;  %v2960_v36 = vmul.f32 %v1886_v56, %v2845_v6  ;;  %v608_v56 = vsel %vm601_vm3, %v582_v39, %v2901_v19  ;;  %v548_v14 = vmul.f32 %v532_v20, %v506_v54  ;;  %v659_v9 = vadd.f32 %v643_v11, %v561_v47  ;;  %v776_v25 = vld [vmem:[#allocation2 + $0x250] sm:$0xff] }
 0x223   :  { %v1888_v32 = vpop.eup %1887  ;;  %v1467_v27 = vadd.f32 %v2939_v23, %v2936_v16  ;;  %v706_v39 = vsel %vm699_vm4, %v2909_v40, %v2905_v31  ;;  %v645_v0 = vmul.f32 %v629_v13, %v608_v56  ;;  %v562_v4 = vadd.f32 %v546_v28, %v448_v53  ;;  %v873_v28 = vld [vmem:[#allocation2 + $0x2c8] sm:$0xff]  ;;  %v3379_v56 = vld [vmem:[#allocation14_spill] sm:$0xff] }
 0x224   :  { %v1890_v51 = vpop.eup %1889  ;;  %v2963_v30 = vmul.f32 %v1888_v32, %v2848_v1  ;;  %v450_v1 = vmul.f32 %v434_v33, %v409_v22  ;;  %v644_v32 = vmul.f32 %v628_v55, %v612_v57  ;;  %v646_v33 = vmul.f32 %v630_v35, %v604_v63 }
 0x225   :  { %v1892_v48 = vpop.eup %1891  ;;  %v2973_v62 = vmul.f32 %v1890_v51, %v2880_v3  ;;  %v726_v3 = vld [vmem:[#allocation2 + $0x1c8] sm:$0xff]  ;;  %v727_v51 = vld [vmem:[#allocation2 + $0x1d0] sm:$0xff]  ;;  %v661_v20 = vadd.f32 %v645_v0, %v563_v43  ;;  %v790_v57 = vmul.f32 %v774_v49, %v3378_v34  ;;  %v791_v11 = vmul.f32 %v775_v41, %v3379_v56  ;;  %v1068_v41 = vld [vmem:[#allocation2 + $0x3c0] sm:$0xff] }
 0x226   :  { %v696_v29 = vpop.permute.xlu1 %695  ;;  %v2931_v26 = vpop.permute.xlu0 %916  ;;  %v2976_v6 = vmul.f32 %v1892_v48, %v2887_v44  ;;  %v710_v44 = vsel %vm699_vm4, %v2903_v46, %v2909_v40  ;;  %v1345_v22 = vadd.f32 %v2963_v30, %v2960_v36  ;;  %v743_v54 = vmul.f32 %v727_v51, %v706_v39 }
 0x227   :  { %v714_v18 = vsel %vm699_vm4, %v696_v29, %v2903_v46  ;;  %v702_v19 = vsel %vm699_vm4, %v2905_v31, %v696_v29  ;;  %v742_v40 = vmul.f32 %v726_v3, %v710_v44  ;;  %v564_v52 = vadd.f32 %v548_v14, %v450_v1  ;;  %v777_v14 = vld [vmem:[#allocation2 + $0x258] sm:$0xff]  ;;  %v970_v3 = vld [vmem:[#allocation2 + $0x340] sm:$0xff]  ;;  %v971_v44 = vld [vmem:[#allocation2 + $0x348] sm:$0xff] }
 0x228   :  { %1343 = vadd.xlane.f32.xlu0 %v1342_v5  ;;  %v741_v15 = vmul.f32 %v725_v37, %v714_v18  ;;  %v728_v5 = vld [vmem:[#allocation2 + $0x1d8] sm:$0xff]  ;;  %v1470_v46 = vadd.f32 %v2976_v6, %v2973_v62  ;;  %v660_v31 = vadd.f32 %v644_v32, %v562_v4  ;;  %v759_v13 = vadd.f32 %v743_v54, %v661_v20  ;;  %v972_v54 = vld [vmem:[#allocation2 + $0x350] sm:$0xff]  ;;  %v1069_v20 = vld [vmem:[#allocation2 + $0x3c8] sm:$0xff] }
 0x229   :  { %v744_v29 = vmul.f32 %v728_v5, %v702_v19  ;;  %v662_v53 = vadd.f32 %v646_v33, %v564_v52  ;;  %v3381_v33 = vld [vmem:[#allocation15_spill] sm:$0xff] }
 0x22a   :  { %v827_v45 = vpop.permute.xlu1 %826  ;;  %v2968_v21 = vpop.permute.xlu0 %932  ;;  %v757_v58 = vadd.f32 %v741_v15, %v659_v9  ;;  %v758_v18 = vadd.f32 %v742_v40, %v660_v31  ;;  %v875_v15 = vld [vmem:[#allocation2 + $0x2d8] sm:$0xff]  ;;  %v793_v9 = vmul.f32 %v777_v14, %v3381_v33 }
 0x22b   :  { %v853_v59 = vsel %vm846_vm5, %v827_v45, %v2911_v12  ;;  %v857_v1 = vsel %vm846_vm5, %v2907_v17, %v827_v45  ;;  %v760_v35 = vadd.f32 %v744_v29, %v662_v53  ;;  %v874_v45 = vld [vmem:[#allocation2 + $0x2d0] sm:$0xff]  ;;  %v973_v52 = vld [vmem:[#allocation2 + $0x358] sm:$0xff]  ;;  %v1167_v53 = vld [vmem:[#allocation2 + $0x448] sm:$0xff] }
 0x22c   :  { %1468 = vadd.xlane.f32.xlu0 %v1467_v27  ;;  %v872_v27 = vld [vmem:[#allocation2 + $0x2c0] sm:$0xff]  ;;  %v806_v63 = vadd.f32 %v790_v57, %v757_v58  ;;  %v889_v39 = vmul.f32 %v873_v28, %v853_v59 }
 0x22d   :  { %v888_v51 = vmul.f32 %v872_v27, %v857_v1 }
 0x22e   :  { %v843_v50 = vpop.permute.xlu1 %842  ;;  %v2995_v48 = vpop.permute.xlu0 %1014 }
 0x22f   :  { %v849_v0 = vsel %vm846_vm5, %v2911_v12, %v843_v50  ;;  %v861_v5 = vsel %vm846_vm5, %v843_v50, %v2907_v17  ;;  %v809_v50 = vadd.f32 %v793_v9, %v760_v35  ;;  %v904_v34 = vadd.f32 %v888_v51, %v806_v63 }
 0x230   :  { %1471 = vadd.xlane.f32.xlu0 %v1470_v46  ;;  %1346 = vadd.xlane.f32.xlu1 %v1345_v22  ;;  %v807_v46 = vadd.f32 %v791_v11, %v758_v18  ;;  %v3380_v22 = vld [vmem:[#allocation13_spill] sm:$0xff]  ;;  %v890_v29 = vmul.f32 %v874_v45, %v849_v0  ;;  %v891_v58 = vmul.f32 %v875_v15, %v861_v5  ;;  %v1168_v45 = vld [vmem:[#allocation2 + $0x450] sm:$0xff]  ;;  %v1169_v15 = vld [vmem:[#allocation2 + $0x458] sm:$0xff] }
 0x231   :  { %v792_v4 = vmul.f32 %v776_v25, %v3380_v22 }
 0x232   :  { %v925_v55 = vpop.permute.xlu1 %924  ;;  %v3002_v37 = vpop.permute.xlu0 %1030  ;;  %v905_v57 = vadd.f32 %v889_v39, %v807_v46  ;;  %v907_v63 = vadd.f32 %v891_v58, %v809_v50 }
 0x233   :  { %v951_v47 = vsel %vm944_vm6, %v925_v55, %v2968_v21  ;;  %v955_v32 = vsel %vm944_vm6, %v2931_v26, %v925_v55  ;;  %v808_v17 = vadd.f32 %v792_v4, %v759_v13  ;;  %v1166_v55 = vld [vmem:[#allocation2 + $0x440] sm:$0xff] }
 0x234   :  { %v986_v49 = vmul.f32 %v970_v3, %v955_v32  ;;  %v987_v43 = vmul.f32 %v971_v44, %v951_v47  ;;  %v1070_v47 = vld [vmem:[#allocation2 + $0x3d0] sm:$0xff]  ;;  %v1071_v32 = vld [vmem:[#allocation2 + $0x3d8] sm:$0xff] }
 0x235   :  { %v906_v35 = vadd.f32 %v890_v29, %v808_v17  ;;  %v3382_v17 = vld [vmem:[#allocation10_spill] sm:$0xff] }
 0x236   :  { %v941_v19 = vpop.permute.xlu1 %940  ;;  %v1121_v40 = vpop.permute.xlu0 %1120  ;;  %v1002_v56 = vadd.f32 %v986_v49, %v904_v34  ;;  %v1003_v11 = vadd.f32 %v987_v43, %v905_v57 }
 0x237   :  { %v947_v31 = vsel %vm944_vm6, %v2968_v21, %v941_v19  ;;  %v959_v12 = vsel %vm944_vm6, %v941_v19, %v2931_v26  ;;  %v1147_v18 = vsel %vm1140_vm8, %v1121_v40, %v2882_v38  ;;  %v1151_v21 = vsel %vm1140_vm8, %v2868_v10, %v1121_v40 }
 0x238   :  { %v988_v26 = vmul.f32 %v972_v54, %v947_v31  ;;  %v989_v28 = vmul.f32 %v973_v52, %v959_v12  ;;  %v1182_v3 = vmul.f32 %v1166_v55, %v1151_v21  ;;  %v1183_v44 = vmul.f32 %v1167_v53, %v1147_v18 }
 0x23a   :  { %v1023_v27 = vpop.permute.xlu1 %1022  ;;  %v1137_v13 = vpop.permute.xlu0 %1136  ;;  %v1004_v46 = vadd.f32 %v988_v26, %v906_v35  ;;  %v1005_v22 = vadd.f32 %v989_v28, %v907_v63 }
 0x23b   :  { %v1049_v59 = vsel %vm1042_vm7, %v1023_v27, %v3002_v37  ;;  %v1053_v1 = vsel %vm1042_vm7, %v2995_v48, %v1023_v27  ;;  %v1143_v0 = vsel %vm1140_vm8, %v2882_v38, %v1137_v13  ;;  %v1155_v5 = vsel %vm1140_vm8, %v1137_v13, %v2868_v10 }
 0x23c   :  { %v1084_v25 = vmul.f32 %v1068_v41, %v1053_v1  ;;  %v1085_v14 = vmul.f32 %v1069_v20, %v1049_v59  ;;  %v1184_v54 = vmul.f32 %v1168_v45, %v1143_v0  ;;  %v1185_v52 = vmul.f32 %v1169_v15, %v1155_v5 }
 0x23e   :  { %v1100_v51 = vadd.f32 %v1084_v25, %v1002_v56  ;;  %v1101_v39 = vadd.f32 %v1085_v14, %v1003_v11  ;;  %v1039_v19 = vpop.permute.xlu1 %1038  ;;  %v3055_v9 = vpop.permute.xlu0 %378 }
 0x23f   :  { %v1045_v4 = vsel %vm1042_vm7, %v3002_v37, %v1039_v19  ;;  %v1057_v33 = vsel %vm1042_vm7, %v1039_v19, %v2995_v48 }
 0x240   :  { %v1198_v40 = vadd.f32 %v1182_v3, %v1100_v51  ;;  %v1199_v49 = vadd.f32 %v1183_v44, %v1101_v39  ;;  %v1086_v38 = vmul.f32 %v1070_v47, %v1045_v4  ;;  %v1087_v43 = vmul.f32 %v1071_v32, %v1057_v33 }
 0x242   :  { %v1102_v10 = vadd.f32 %v1086_v38, %v1004_v46  ;;  %v1103_v31 = vadd.f32 %v1087_v43, %v1005_v22  ;;  %v3057_v12 = vpop.permute.xlu1 %1016  ;;  %v1238_v50 = vadd.f32 %v3382_v17, %v1198_v40  ;;  %v1239_v37 = vadd.f32 %v3382_v17, %v1199_v49  ;;  %v3061_v29 = vpop.permute.xlu0 %394  ;;  %v533_v43 = vld [vmem:[#allocation2 + $0xe0] sm:$0xff] }
 0x244   :  { %v1200_v58 = vadd.f32 %v1184_v54, %v1102_v10  ;;  %v1201_v48 = vadd.f32 %v1185_v52, %v1103_v31  ;;  %v1254_v41 = vsub.f32 0.0, %v1238_v50  ;;  %v1255_v20 = vsub.f32 0.0, %v1239_v37 }
 0x246   :  { %v3063_v34 = vpop.permute.xlu1 %1032  ;;  %v1278_v57 = vmul.f32 1.442695, %v1254_v41  ;;  %v1280_v55 = vmul.f32 1.442695, %v1255_v20  ;;  %v1240_v53 = vadd.f32 %v3382_v17, %v1200_v58  ;;  %v1241_v18 = vadd.f32 %v3382_v17, %v1201_v48  ;;  %v478_v21 = vpop.permute.xlu0 %477  ;;  %v436_v17 = vld [vmem:[#allocation2 + $0x68] sm:$0xff]  ;;  %v435_v48 = vld [vmem:[#allocation2 + $0x60] sm:$0xff] }
 0x247   :  { %v631_v20 = vld [vmem:[#allocation2 + $0x160] sm:$0xff] }
 0x248   :  { %1893 = vpow2.f32 %v1278_v57  ;;  %v1256_v27 = vsub.f32 0.0, %v1240_v53  ;;  %v1257_v26 = vsub.f32 0.0, %v1241_v18 }
 0x249   :  { %1895 = vpow2.f32 %v1280_v55 }
 0x24a   :  { %v387_v28 = vpop.permute.xlu1 %386  ;;  %v1282_v59 = vmul.f32 1.442695, %v1256_v27  ;;  %v1284_v1 = vmul.f32 1.442695, %v1257_v26  ;;  %v494_v13 = vpop.permute.xlu0 %493  ;;  %v534_v27 = vld [vmem:[#allocation2 + $0xe8] sm:$0xff]  ;;  %v535_v26 = vld [vmem:[#allocation2 + $0xf0] sm:$0xff] }
 0x24c   :  { %1897 = vpow2.f32 %v1282_v59  ;;  %v536_v59 = vld [vmem:[#allocation2 + $0xf8] sm:$0xff] }
 0x24d   :  { %1899 = vpow2.f32 %v1284_v1 }
 0x24e   :  { %v403_v56 = vpop.permute.xlu1 %402  ;;  %v576_v11 = vpop.permute.xlu0 %575 }
 0x24f   :  { %v422_v41 = vsel %vm406_vm1, %v403_v56, %v3055_v9 }
 0x252   :  { %v1894_v25 = vpop.eup %1893  ;;  %v486_v14 = vpop.permute.xlu1 %485 }
 0x253   :  { %v1896_v35 = vpop.eup %1895  ;;  %v3067_v63 = vpop.permute.xlu0 %591  ;;  %v1302_v3 = vadd.f32 1.0, %v1894_v25 }
 0x254   :  { %v1303_v44 = vadd.f32 1.0, %v1896_v35 }
 0x255   :  { %1901 = vrcp.f32 %v1302_v3  ;;  %v729_v3 = vld [vmem:[#allocation2 + $0x1e0] sm:$0xff] }
 0x256   :  { %v1898_v47 = vpop.eup %1897  ;;  %v502_v32 = vpop.permute.xlu1 %501  ;;  %1903 = vrcp.f32 %v1303_v44 }
 0x257   :  { %v1900_v51 = vpop.eup %1899  ;;  %v3069_v39 = vpop.permute.xlu0 %673  ;;  %v1304_v45 = vadd.f32 1.0, %v1898_v47  ;;  %v519_v54 = vsel %vm503_vm2, %v502_v32, %v478_v21  ;;  %v507_v1 = vsel %vm503_vm2, %v494_v13, %v502_v32  ;;  %v633_v32 = vld [vmem:[#allocation2 + $0x170] sm:$0xff] }
 0x258   :  { %v1305_v15 = vadd.f32 1.0, %v1900_v51  ;;  %v451_v51 = vmul.f32 %v435_v48, %v422_v41 }
 0x259   :  { %1905 = vrcp.f32 %v1304_v45 }
 0x25a   :  { %v584_v0 = vpop.permute.xlu1 %583  ;;  %1907 = vrcp.f32 %v1305_v15  ;;  %v438_v15 = vld [vmem:[#allocation2 + $0x78] sm:$0xff] }
 0x25b   :  { %v3071_v5 = vpop.permute.xlu0 %689  ;;  %v609_v45 = vsel %vm601_vm3, %v584_v0, %v3067_v63 }
 0x25e   :  { %v600_v19 = vpop.permute.xlu1 %599 }
 0x25f   :  { %v1902_v46 = vpop.eup %1901  ;;  %v3073_v22 = vpop.permute.xlu0 %820  ;;  %v617_v57 = vsel %vm601_vm3, %v600_v19, %v576_v11 }
 0x260   :  { %v1904_v4 = vpop.eup %1903  ;;  %v3075_v33 = vmul.f32 %v1902_v46, %v1238_v50  ;;  %v418_v50 = vsel %vm406_vm1, %v3055_v9, %v387_v28  ;;  %v549_v9 = vmul.f32 %v533_v43, %v519_v54  ;;  %v634_v43 = vld [vmem:[#allocation2 + $0x178] sm:$0xff]  ;;  %v605_v54 = vsel %vm601_vm3, %v3067_v63, %v600_v19 }
 0x261   :  { %v3077_v40 = vmul.f32 %v1904_v4, %v1239_v37  ;;  %v414_v37 = vsel %vm406_vm1, %v387_v28, %v3061_v29  ;;  %v515_v28 = vsel %vm503_vm2, %v478_v21, %v486_v14  ;;  %v452_v35 = vmul.f32 %v436_v17, %v418_v50  ;;  %v731_v17 = vld [vmem:[#allocation2 + $0x1f0] sm:$0xff] }
 0x262   :  { %v682_v49 = vpop.permute.xlu1 %681  ;;  %v550_v46 = vmul.f32 %v534_v27, %v515_v28  ;;  %v732_v27 = vld [vmem:[#allocation2 + $0x1f8] sm:$0xff] }
 0x263   :  { %v1906_v38 = vpop.eup %1905  ;;  %v3081_v52 = vpop.permute.xlu0 %836  ;;  %v1348_v10 = vadd.f32 %v3077_v40, %v3075_v33  ;;  %v707_v50 = vsel %vm699_vm4, %v682_v49, %v3071_v5 }
 0x264   :  { %v1908_v31 = vpop.eup %1907  ;;  %v3088_v58 = vmul.f32 %v1906_v38, %v1240_v53  ;;  %v511_v53 = vsel %vm503_vm2, %v486_v14, %v494_v13  ;;  %v437_v14 = vld [vmem:[#allocation2 + $0x70] sm:$0xff]  ;;  %v632_v13 = vld [vmem:[#allocation2 + $0x168] sm:$0xff]  ;;  %v552_v38 = vmul.f32 %v536_v59, %v507_v1  ;;  %v566_v59 = vadd.f32 %v550_v46, %v452_v35 }
 0x265   :  { %1349 = vadd.xlane.f32.xlu1 %v1348_v10  ;;  %v3098_v55 = vmul.f32 %v1908_v31, %v1241_v18  ;;  %v410_v18 = vsel %vm406_vm1, %v3061_v29, %v403_v56  ;;  %v613_v29 = vsel %vm601_vm3, %v576_v11, %v584_v0  ;;  %v647_v56 = vmul.f32 %v631_v20, %v617_v57  ;;  %v730_v31 = vld [vmem:[#allocation2 + $0x1e8] sm:$0xff] }
 0x266   :  { %v698_v25 = vpop.permute.xlu1 %697  ;;  %v551_v4 = vmul.f32 %v535_v26, %v511_v53  ;;  %v565_v10 = vadd.f32 %v549_v9, %v451_v51  ;;  %v711_v11 = vsel %vm699_vm4, %v3069_v39, %v682_v49  ;;  %v453_v41 = vmul.f32 %v437_v14, %v414_v37  ;;  %v778_v51 = vld [vmem:[#allocation2 + $0x260] sm:$0xff]  ;;  %v779_v37 = vld [vmem:[#allocation2 + $0x268] sm:$0xff] }
 0x267   :  { %v715_v44 = vsel %vm699_vm4, %v698_v25, %v3069_v39  ;;  %v3112_v47 = vpop.permute.xlu0 %918  ;;  %v1473_v21 = vadd.f32 %v3098_v55, %v3088_v58  ;;  %v648_v20 = vmul.f32 %v632_v13, %v613_v29  ;;  %v649_v57 = vmul.f32 %v633_v32, %v609_v45  ;;  %v876_v32 = vld [vmem:[#allocation2 + $0x2e0] sm:$0xff]  ;;  %v877_v45 = vld [vmem:[#allocation2 + $0x2e8] sm:$0xff] }
 0x268   :  { %v745_v0 = vmul.f32 %v729_v3, %v715_v44  ;;  %v703_v63 = vsel %vm699_vm4, %v3071_v5, %v698_v25  ;;  %v454_v26 = vmul.f32 %v438_v15, %v410_v18  ;;  %v650_v53 = vmul.f32 %v634_v43, %v605_v54  ;;  %v974_v43 = vld [vmem:[#allocation2 + $0x360] sm:$0xff] }
 0x269   :  { %1474 = vadd.xlane.f32.xlu0 %v1473_v21  ;;  %v663_v28 = vadd.f32 %v647_v56, %v565_v10  ;;  %v567_v1 = vadd.f32 %v551_v4, %v453_v41  ;;  %v746_v9 = vmul.f32 %v730_v31, %v711_v11  ;;  %v747_v21 = vmul.f32 %v731_v17, %v707_v50  ;;  %v780_v4 = vld [vmem:[#allocation2 + $0x270] sm:$0xff]  ;;  %v975_v50 = vld [vmem:[#allocation2 + $0x368] sm:$0xff]  ;;  %v879_v41 = vld [vmem:[#allocation2 + $0x2f8] sm:$0xff] }
 0x26a   :  { %v829_v48 = vpop.permute.xlu1 %828  ;;  %v568_v39 = vadd.f32 %v552_v38, %v454_v26  ;;  %v748_v49 = vmul.f32 %v732_v27, %v703_v63  ;;  %v664_v14 = vadd.f32 %v648_v20, %v566_v59  ;;  %v794_v35 = vmul.f32 %v778_v51, %v2522_v8  ;;  %v781_v38 = vld [vmem:[#allocation2 + $0x278] sm:$0xff]  ;;  %v878_v17 = vld [vmem:[#allocation2 + $0x2f0] sm:$0xff] }
 0x26b   :  { %v935_v19 = vpop.permute.xlu0 %934  ;;  %v761_v3 = vadd.f32 %v745_v0, %v663_v28  ;;  %v665_v13 = vadd.f32 %v649_v57, %v567_v1  ;;  %v858_v5 = vsel %vm846_vm5, %v3073_v22, %v829_v48  ;;  %v854_v29 = vsel %vm846_vm5, %v829_v48, %v3081_v52  ;;  %v976_v59 = vld [vmem:[#allocation2 + $0x370] sm:$0xff]  ;;  %v977_v1 = vld [vmem:[#allocation2 + $0x378] sm:$0xff] }
 0x26c   :  { %v666_v18 = vadd.f32 %v650_v53, %v568_v39  ;;  %v762_v56 = vadd.f32 %v746_v9, %v664_v14  ;;  %v795_v46 = vmul.f32 %v779_v37, %v2565_v61  ;;  %v892_v31 = vmul.f32 %v876_v32, %v858_v5 }
 0x26d   :  { %v763_v15 = vadd.f32 %v747_v21, %v665_v13  ;;  %v810_v10 = vadd.f32 %v794_v35, %v761_v3  ;;  %v893_v0 = vmul.f32 %v877_v45, %v854_v29  ;;  %v796_v27 = vmul.f32 %v780_v4, %v2553_v60  ;;  %v1072_v3 = vld [vmem:[#allocation2 + $0x3e0] sm:$0xff]  ;;  %v1073_v13 = vld [vmem:[#allocation2 + $0x3e8] sm:$0xff] }
 0x26e   :  { %v845_v44 = vpop.permute.xlu1 %844  ;;  %v764_v54 = vadd.f32 %v748_v49, %v666_v18  ;;  %v811_v26 = vadd.f32 %v795_v46, %v762_v56  ;;  %v1170_v29 = vld [vmem:[#allocation2 + $0x460] sm:$0xff]  ;;  %v1074_v46 = vld [vmem:[#allocation2 + $0x3f0] sm:$0xff]  ;;  %v1171_v4 = vld [vmem:[#allocation2 + $0x468] sm:$0xff] }
 0x26f   :  { %v3136_v25 = vpop.permute.xlu0 %1114  ;;  %v850_v8 = vsel %vm846_vm5, %v3081_v52, %v845_v44  ;;  %v862_v48 = vsel %vm846_vm5, %v845_v44, %v3073_v22  ;;  %v797_v52 = vmul.f32 %v781_v38, %v2568_v24  ;;  %v908_v9 = vadd.f32 %v892_v31, %v810_v10 }
 0x270   :  { %v894_v53 = vmul.f32 %v878_v17, %v850_v8  ;;  %v812_v22 = vadd.f32 %v796_v27, %v763_v15  ;;  %v895_v51 = vmul.f32 %v879_v41, %v862_v48  ;;  %v909_v49 = vadd.f32 %v893_v0, %v811_v26 }
 0x271   :  { %v813_v21 = vadd.f32 %v797_v52, %v764_v54  ;;  %v1075_v54 = vld [vmem:[#allocation2 + $0x3f8] sm:$0xff] }
 0x272   :  { %v927_v11 = vpop.permute.xlu1 %926  ;;  %v910_v35 = vadd.f32 %v894_v53, %v812_v22 }
 0x273   :  { %v952_v61 = vsel %vm944_vm6, %v927_v11, %v935_v19  ;;  %v956_v20 = vsel %vm944_vm6, %v3112_v47, %v927_v11  ;;  %v1025_v57 = vpop.permute.xlu0 %1024  ;;  %v911_v56 = vadd.f32 %v895_v51, %v813_v21 }
 0x274   :  { %v990_v63 = vmul.f32 %v974_v43, %v956_v20  ;;  %v991_v28 = vmul.f32 %v975_v50, %v952_v61  ;;  %v1054_v37 = vsel %vm1042_vm7, %v3057_v12, %v1025_v57  ;;  %v1050_v32 = vsel %vm1042_vm7, %v1025_v57, %v3063_v34  ;;  %v1172_v61 = vld [vmem:[#allocation2 + $0x470] sm:$0xff]  ;;  %v1173_v20 = vld [vmem:[#allocation2 + $0x478] sm:$0xff] }
 0x275   :  { %v1088_v15 = vmul.f32 %v1072_v3, %v1054_v37  ;;  %v1089_v38 = vmul.f32 %v1073_v13, %v1050_v32 }
 0x276   :  { %v943_v39 = vpop.permute.xlu1 %942  ;;  %v1006_v14 = vadd.f32 %v990_v63, %v908_v9  ;;  %v1007_v45 = vadd.f32 %v991_v28, %v909_v49 }
 0x277   :  { %v948_v60 = vsel %vm944_vm6, %v935_v19, %v943_v39  ;;  %v960_v24 = vsel %vm944_vm6, %v943_v39, %v3112_v47  ;;  %v1041_v44 = vpop.permute.xlu0 %1040 }
 0x278   :  { %v992_v5 = vmul.f32 %v976_v59, %v948_v60  ;;  %v993_v18 = vmul.f32 %v977_v1, %v960_v24  ;;  %v1046_v19 = vsel %vm1042_vm7, %v3063_v34, %v1041_v44  ;;  %v1058_v10 = vsel %vm1042_vm7, %v1041_v44, %v3057_v12  ;;  %v3383_v59 = vld [vmem:[#allocation11_spill] sm:$0xff] }
 0x279   :  { %v1104_v8 = vadd.f32 %v1088_v15, %v1006_v14  ;;  %v1105_v0 = vadd.f32 %v1089_v38, %v1007_v45  ;;  %v1090_v41 = vmul.f32 %v1074_v46, %v1046_v19  ;;  %v1091_v57 = vmul.f32 %v1075_v54, %v1058_v10 }
 0x27a   :  { %v1123_v47 = vpop.permute.xlu1 %1122  ;;  %v1008_v43 = vadd.f32 %v992_v5, %v910_v35  ;;  %v1009_v50 = vadd.f32 %v993_v18, %v911_v56 }
 0x27b   :  { %v1152_v31 = vsel %vm1140_vm8, %v3136_v25, %v1123_v47  ;;  %v1131_v17 = vpop.permute.xlu0 %1130 }
 0x27c   :  { %v1186_v11 = vmul.f32 %v1170_v29, %v1152_v31  ;;  %v1148_v34 = vsel %vm1140_vm8, %v1123_v47, %v1131_v17  ;;  %v1106_v12 = vadd.f32 %v1090_v41, %v1008_v43  ;;  %v1107_v28 = vadd.f32 %v1091_v57, %v1009_v50 }
 0x27d   :  { %v1187_v48 = vmul.f32 %v1171_v4, %v1148_v34 }
 0x27e   :  { %v1202_v27 = vadd.f32 %v1186_v11, %v1104_v8  ;;  %v1139_v52 = vpop.permute.xlu1 %1138 }
 0x27f   :  { %v1203_v63 = vadd.f32 %v1187_v48, %v1105_v0  ;;  %v1144_v26 = vsel %vm1140_vm8, %v1131_v17, %v1139_v52  ;;  %v1156_v53 = vsel %vm1140_vm8, %v1139_v52, %v3136_v25 }
 0x280   :  { %v1242_v1 = vadd.f32 %v3383_v59, %v1202_v27  ;;  %v1188_v9 = vmul.f32 %v1172_v61, %v1144_v26  ;;  %v1189_v22 = vmul.f32 %v1173_v20, %v1156_v53  ;;  %v1359_v61 = vld [vmem:[%s3306_s5 + $0x8] sm:$0xff]  ;;  %v1358_v20 = vld [vmem:[%s3306_s5] sm:$0xff]  ;;  %v1360_v27 = vld [vmem:[%s3306_s5 + $0x10] sm:$0xff] }
 0x281   :  { %v1243_v21 = vadd.f32 %v3383_v59, %v1203_v63 }
 0x282   :  { %v1258_v51 = vsub.f32 0.0, %v1242_v1  ;;  %v1204_v39 = vadd.f32 %v1188_v9, %v1106_v12  ;;  %v1205_v49 = vadd.f32 %v1189_v22, %v1107_v28 }
 0x283   :  { %v1259_v3 = vsub.f32 0.0, %v1243_v21 }
 0x284   :  { %v1286_v37 = vmul.f32 1.442695, %v1258_v51  ;;  %v1244_v60 = vadd.f32 %v3383_v59, %v1204_v39  ;;  %v1245_v24 = vadd.f32 %v3383_v59, %v1205_v49 }
 0x285   :  { %v1288_v44 = vmul.f32 1.442695, %v1259_v3 }
 0x286   :  { %1909 = vpow2.f32 %v1286_v37  ;;  %v1260_v2 = vsub.f32 0.0, %v1244_v60  ;;  %v1261_v25 = vsub.f32 0.0, %v1245_v24 }
 0x287   :  { %1911 = vpow2.f32 %v1288_v44 }
 0x288   :  { %v1290_v14 = vmul.f32 1.442695, %v1260_v2  ;;  %v1292_v13 = vmul.f32 1.442695, %v1261_v25 }
 0x28a   :  { %1913 = vpow2.f32 %v1290_v14 }
 0x28b   :  { %1915 = vpow2.f32 %v1292_v13 }
 0x290   :  { %v1910_v32 = vpop.eup %1909 }
 0x291   :  { %v1912_v5 = vpop.eup %1911  ;;  %v1306_v18 = vadd.f32 1.0, %v1910_v32 }
 0x292   :  { %v1307_v35 = vadd.f32 1.0, %v1912_v5 }
 0x293   :  { %1917 = vrcp.f32 %v1306_v18 }
 0x294   :  { %v1914_v45 = vpop.eup %1913  ;;  %1919 = vrcp.f32 %v1307_v35 }
 0x295   :  { %v1916_v29 = vpop.eup %1915  ;;  %v1308_v56 = vadd.f32 1.0, %v1914_v45 }
 0x296   :  { %v1309_v15 = vadd.f32 1.0, %v1916_v29 }
 0x297   :  { %1921 = vrcp.f32 %v1308_v56 }
 0x298   :  { %1923 = vrcp.f32 %v1309_v15 }
 0x29d   :  { %v1918_v46 = vpop.eup %1917 }
 0x29e   :  { %v1920_v19 = vpop.eup %1919  ;;  %v3187_v47 = vmul.f32 %v1918_v46, %v1242_v1 }
 0x29f   :  { %v3189_v4 = vmul.f32 %v1920_v19, %v1243_v21  ;;  %v1361_v21 = vld [vmem:[%s3306_s5 + $0x18] sm:$0xff] }
 0x2a1   :  { %v1922_v38 = vpop.eup %1921  ;;  %v1351_v43 = vadd.f32 %v3189_v4, %v3187_v47 }
 0x2a2   :  { %v1924_v54 = vpop.eup %1923  ;;  %v3193_v10 = vmul.f32 %v1922_v38, %v1244_v60 }
 0x2a3   :  { %1352 = vadd.xlane.f32.xlu1 %v1351_v43  ;;  %v3195_v31 = vmul.f32 %v1924_v54, %v1245_v24 }
 0x2a5   :  { %v1476_v17 = vadd.f32 %v3195_v31, %v3193_v10 }
 0x2a7   :  { %1477 = vadd.xlane.f32.xlu0 %v1476_v17 }
 0x2b5   :  { %v1344_v8 = vpop.xlane.xlu0 %1343 }
 0x2b6   :  { %v1354_v48 = vmul.f32 0.00390625, %v1344_v8 }
 0x2b8   :  { %v1362_v26 = vmul.f32 %v1358_v20, %v1354_v48 }
 0x2b9   :  { %v1469_v50 = vpop.xlane.xlu0 %1468 }
 0x2ba   :  { %v1479_v53 = vmul.f32 0.00390625, %v1469_v50  ;;  %v1366_v22 = vsel %vm85_vm0, %v1362_v26, 0.0 }
 0x2bc   :  { %v1483_v39 = vmul.f32 %v1479_v53, %v1358_v20 }
 0x2bd   :  { %v1347_v11 = vpop.xlane.xlu1 %1346  ;;  %v1472_v34 = vpop.xlane.xlu0 %1471 }
 0x2be   :  { %v1355_v41 = vmul.f32 0.00390625, %v1347_v11  ;;  %v1480_v12 = vmul.f32 0.00390625, %v1472_v34  ;;  %v1487_v14 = vsel %vm85_vm0, %v1483_v39, 0.0  ;;  %v1379_v11 = vld [vmem:[%s3307_s6] sm:$0x1] }
 0x2bf   :  { %v1387_v39 = vld [vmem:[%s3308_s7] sm:$0xff] }
 0x2c0   :  { %v1363_v63 = vmul.f32 %v1359_v61, %v1355_v41  ;;  %v1484_v1 = vmul.f32 %v1480_v12, %v1359_v61 }
 0x2c2   :  { %v1367_v9 = vsel %vm85_vm0, %v1363_v63, 0.0  ;;  %v1488_v24 = vsel %vm85_vm0, %v1484_v1, 0.0 }
 0x2c3   :  { %v1368_v60 = vadd.f32 %v1367_v9, %v1366_v22  ;;  %v1489_v18 = vadd.f32 %v1488_v24, %v1487_v14  ;;  %v1390_v14 = vld [vmem:[%s3308_s7 + $0x18] sm:$0xff] }
 0x2f2   :  { %v1350_v0 = vpop.xlane.xlu1 %1349 }
 0x2f3   :  { %v1356_v57 = vmul.f32 0.00390625, %v1350_v0 }
 0x2f5   :  { %v1364_v28 = vmul.f32 %v1360_v27, %v1356_v57 }
 0x2f6   :  { %v1475_v52 = vpop.xlane.xlu0 %1474 }
 0x2f7   :  { %v1481_v59 = vmul.f32 0.00390625, %v1475_v52  ;;  %v1369_v49 = vsel %vm85_vm0, %v1364_v28, 0.0 }
 0x2f8   :  { %v1370_v2 = vadd.f32 %v1369_v49, %v1368_v60 }
 0x2f9   :  { %v1485_v3 = vmul.f32 %v1481_v59, %v1360_v27  ;;  %v3384_v59 = vlaneseq }
 0x2fb   :  { %v1490_v13 = vsel %vm85_vm0, %v1485_v3, 0.0  ;;  %v1392_v1 = vshrl.u32 %v3384_v59, 7 }
 0x2fc   :  { %v1491_v29 = vadd.f32 %v1490_v13, %v1489_v18  ;;  %v1389_v13 = vld [vmem:[%s3308_s7 + $0x10] sm:$0xff] }
 0x2fd   :  { %v1393_v9 = vsub.s32 0, %v1392_v1 }
 0x330   :  { %v1353_v51 = vpop.xlane.xlu1 %1352 }
 0x331   :  { %v1357_v37 = vmul.f32 0.00390625, %v1353_v51  ;;  %v1388_v51 = vld [vmem:[%s3308_s7 + $0x8] sm:$0xff] }
 0x333   :  { %v1365_v44 = vmul.f32 %v1361_v21, %v1357_v37 }
 0x334   :  { %v1478_v25 = vpop.xlane.xlu0 %1477 }
 0x335   :  { %v1371_v32 = vsel %vm85_vm0, %v1365_v44, 0.0  ;;  %v1482_v5 = vmul.f32 0.00390625, %v1478_v25 }
 0x336   :  { %v1372_v35 = vadd.f32 %v1371_v32, %v1370_v2 }
 0x337   :  { %v1486_v45 = vmul.f32 %v1482_v5, %v1361_v21 }
 0x338   :  { %v1373_v56 = vrot.slane %v1372_v35, 4 }
 0x339   :  { %v1492_v15 = vsel %vm85_vm0, %v1486_v45, 0.0 }
 0x33a   :  { %v1374_v46 = vadd.f32 %v1373_v56, %v1372_v35  ;;  %v1493_v19 = vadd.f32 %v1492_v15, %v1491_v29 }
 0x33c   :  { %v1375_v38 = vrot.slane %v1374_v46, 2  ;;  %v1494_v43 = vrot.slane %v1493_v19, 4 }
 0x33e   :  { %v1376_v54 = vadd.f32 %v1375_v38, %v1374_v46  ;;  %v1495_v17 = vadd.f32 %v1494_v43, %v1493_v19 }
 0x340   :  { %v1377_v8 = vrot.slane %v1376_v54, 1  ;;  %v1496_v50 = vrot.slane %v1495_v17, 2 }
 0x342   :  { %v1378_v34 = vadd.f32 %v1377_v8, %v1376_v54  ;;  %v1497_v0 = vadd.f32 %v1496_v50, %v1495_v17  ;;  %v1411_v54 = vld [vmem:[%s3309_s8] sm:$0xff]  ;;  %v1412_v17 = vld [vmem:[%s3309_s8 + $0x8] sm:$0xff] }
 0x344   :  { %v1380_v41 = vadd.f32 %v1379_v11, %v1378_v34  ;;  %v1498_v48 = vrot.slane %v1497_v0, 1 }
 0x346   :  { %v1381_v61 = vsub.f32 0.0, %v1380_v41  ;;  %v1499_v20 = vadd.f32 %v1498_v48, %v1497_v0 }
 0x348   :  { %v1382_v57 = vmul.f32 1.442695, %v1381_v61  ;;  %v1500_v27 = vadd.f32 %v1499_v20, %v1379_v11 }
 0x34a   :  { %1925 = vpow2.f32 %v1382_v57  ;;  %v1501_v52 = vsub.f32 0.0, %v1500_v27 }
 0x34c   :  { %v1502_v12 = vmul.f32 1.442695, %v1501_v52 }
 0x34e   :  { %1927 = vpow2.f32 %v1502_v12  ;;  %v1413_v12 = vld [vmem:[%s3309_s8 + $0x10] sm:$0xff] }
 0x354   :  { %v1926_v63 = vpop.eup %1925 }
 0x355   :  { %v1384_v26 = vadd.f32 1.0, %v1926_v63  ;;  %v1414_v63 = vld [vmem:[%s3309_s8 + $0x18] sm:$0xff] }
 0x357   :  { %1929 = vrcp.f32 %v1384_v26 }
 0x358   :  { %v1928_v53 = vpop.eup %1927 }
 0x359   :  { %v1504_v28 = vadd.f32 1.0, %v1928_v53 }
 0x35b   :  { %1931 = vrcp.f32 %v1504_v28 }
 0x361   :  { %v1930_v22 = vpop.eup %1929 }
 0x362   :  { %v1386_v21 = vmul.f32 %v1930_v22, %v1380_v41 }
 0x364   :  { %v1394_v49 = vrot.slane %v1386_v21, %v1393_v9 }
 0x365   :  { %v1932_v3 = vpop.eup %1931 }
 0x366   :  { %v1396_v37 = vmul.f32 %v1394_v49, %v1388_v51  ;;  %v1395_v60 = vmul.f32 %v1394_v49, %v1387_v39  ;;  %v1506_v24 = vmul.f32 %v1932_v3, %v1500_v27  ;;  %v1398_v45 = vmul.f32 %v1394_v49, %v1390_v14 }
 0x367   :  { %v1397_v29 = vmul.f32 %v1394_v49, %v1389_v13 }
 0x368   :  { %v1402_v44 = vsel %vm85_vm0, %v1396_v37, 0.0  ;;  %v1399_v2 = vsel %vm85_vm0, %v1395_v60, 0.0  ;;  %v1510_v25 = vrot.slane %v1506_v24, %v1393_v9  ;;  %v1408_v56 = vsel %vm85_vm0, %v1398_v45, 0.0 }
 0x369   :  { %1403 = vadd.xlane.f32.xlu0 %v1402_v44  ;;  %1400 = vadd.xlane.f32.xlu1 %v1399_v2  ;;  %v1405_v15 = vsel %vm85_vm0, %v1397_v29, 0.0 }
 0x36a   :  { %v1512_v32 = vmul.f32 %v1510_v25, %v1388_v51  ;;  %v1511_v5 = vmul.f32 %v1510_v25, %v1387_v39  ;;  %v1514_v46 = vmul.f32 %v1510_v25, %v1390_v14  ;;  %v1513_v19 = vmul.f32 %v1510_v25, %v1389_v13 }
 0x36c   :  { %v1518_v18 = vsel %vm85_vm0, %v1512_v32, 0.0  ;;  %v1515_v35 = vsel %vm85_vm0, %v1511_v5, 0.0  ;;  %v1524_v38 = vsel %vm85_vm0, %v1514_v46, 0.0  ;;  %v1521_v43 = vsel %vm85_vm0, %v1513_v19, 0.0 }
 0x36d   :  { %1519 = vadd.xlane.f32.xlu0 %v1518_v18  ;;  %1516 = vadd.xlane.f32.xlu1 %v1515_v35 }
 0x371   :  { %1409 = vadd.xlane.f32.xlu0 %v1408_v56  ;;  %1406 = vadd.xlane.f32.xlu1 %v1405_v15 }
 0x375   :  { %1525 = vadd.xlane.f32.xlu0 %v1524_v38  ;;  %1522 = vadd.xlane.f32.xlu1 %v1521_v43 }
 0x3f6   :  { %v1401_v8 = vpop.xlane.xlu1 %1400  ;;  %v1404_v50 = vpop.xlane.xlu0 %1403 }
 0x3f7   :  { %v1415_v11 = vadd.f32 %v1411_v54, %v1401_v8  ;;  %v1416_v34 = vadd.f32 %v1412_v17, %v1404_v50 }
 0x3f9   :  { %v1419_v0 = vsub.f32 0.0, %v1415_v11  ;;  %v1420_v41 = vsub.f32 0.0, %v1416_v34 }
 0x3fa   :  { %v1517_v48 = vpop.xlane.xlu1 %1516  ;;  %v1520_v61 = vpop.xlane.xlu0 %1519 }
 0x3fb   :  { %v1423_v20 = vmul.f32 1.442695, %v1419_v0  ;;  %v1425_v57 = vmul.f32 1.442695, %v1420_v41  ;;  %v1527_v27 = vadd.f32 %v1517_v48, %v1411_v54  ;;  %v1528_v52 = vadd.f32 %v1520_v61, %v1412_v17 }
 0x3fd   :  { %1933 = vpow2.f32 %v1423_v20  ;;  %v1531_v26 = vsub.f32 0.0, %v1527_v27  ;;  %v1532_v53 = vsub.f32 0.0, %v1528_v52 }
 0x3fe   :  { %1935 = vpow2.f32 %v1425_v57  ;;  %v1407_v28 = vpop.xlane.xlu1 %1406  ;;  %v1410_v59 = vpop.xlane.xlu0 %1409  ;;  %v1580_v57 = vld [vmem:[%s3311_s10] sm:$0xff] }
 0x3ff   :  { %v1535_v1 = vmul.f32 1.442695, %v1531_v26  ;;  %v1537_v9 = vmul.f32 1.442695, %v1532_v53  ;;  %v1417_v22 = vadd.f32 %v1413_v12, %v1407_v28  ;;  %v1418_v21 = vadd.f32 %v1414_v63, %v1410_v59 }
 0x401   :  { %1937 = vpow2.f32 %v1535_v1  ;;  %v1421_v51 = vsub.f32 0.0, %v1417_v22  ;;  %v1422_v39 = vsub.f32 0.0, %v1418_v21 }
 0x402   :  { %1939 = vpow2.f32 %v1537_v9  ;;  %v1523_v49 = vpop.xlane.xlu1 %1522  ;;  %v1526_v3 = vpop.xlane.xlu0 %1525 }
 0x403   :  { %v1427_v37 = vmul.f32 1.442695, %v1421_v51  ;;  %v1429_v60 = vmul.f32 1.442695, %v1422_v39  ;;  %v1529_v24 = vadd.f32 %v1523_v49, %v1413_v12  ;;  %v1530_v44 = vadd.f32 %v1526_v3, %v1414_v63 }
 0x405   :  { %1941 = vpow2.f32 %v1427_v37  ;;  %v1533_v2 = vsub.f32 0.0, %v1529_v24  ;;  %v1534_v25 = vsub.f32 0.0, %v1530_v44 }
 0x406   :  { %1943 = vpow2.f32 %v1429_v60 }
 0x407   :  { %v1934_v14 = vpop.eup %1933  ;;  %v1539_v13 = vmul.f32 1.442695, %v1533_v2  ;;  %v1541_v18 = vmul.f32 1.442695, %v1534_v25 }
 0x408   :  { %v1936_v32 = vpop.eup %1935  ;;  %v1431_v5 = vadd.f32 1.0, %v1934_v14 }
 0x409   :  { %v1432_v35 = vadd.f32 1.0, %v1936_v32  ;;  %1945 = vpow2.f32 %v1539_v13 }
 0x40a   :  { %1947 = vrcp.f32 %v1431_v5  ;;  %v1966_v5 = vld [vmem:[%s3301_s0 + $0x8] sm:$0xff] }
 0x40b   :  { %v1938_v45 = vpop.eup %1937  ;;  %1949 = vrcp.f32 %v1432_v35 }
 0x40c   :  { %v1940_v29 = vpop.eup %1939  ;;  %v1543_v56 = vadd.f32 1.0, %v1938_v45  ;;  %1951 = vpow2.f32 %v1541_v18 }
 0x40d   :  { %v1544_v15 = vadd.f32 1.0, %v1940_v29 }
 0x40e   :  { %1953 = vrcp.f32 %v1543_v56 }
 0x40f   :  { %v1942_v46 = vpop.eup %1941  ;;  %1955 = vrcp.f32 %v1544_v15  ;;  %v1967_v15 = vld [vmem:[%s3301_s0 + $0x10] sm:$0xff] }
 0x410   :  { %v1944_v19 = vpop.eup %1943  ;;  %v1433_v38 = vadd.f32 1.0, %v1942_v46 }
 0x411   :  { %v1434_v43 = vadd.f32 1.0, %v1944_v19  ;;  %v1968_v19 = vld [vmem:[%s3301_s0 + $0x18] sm:$0xff] }
 0x412   :  { %1957 = vrcp.f32 %v1433_v38 }
 0x413   :  { %v1946_v54 = vpop.eup %1945  ;;  %1959 = vrcp.f32 %v1434_v43 }
 0x414   :  { %v1948_v17 = vpop.eup %1947  ;;  %v1545_v8 = vadd.f32 1.0, %v1946_v54 }
 0x415   :  { %v1950_v50 = vpop.eup %1949  ;;  %1441 = vperm.xlu1 %1796, %v1948_v17  }
 0x416   :  { %v1952_v11 = vpop.eup %1951  ;;  %1961 = vrcp.f32 %v1545_v8  ;;  %1446 = vperm.xlu0 %1795, %v1950_v50  }
 0x417   :  { %v1546_v34 = vadd.f32 1.0, %v1952_v11 }
 0x418   :  { %v1954_v0 = vpop.eup %1953 }
 0x419   :  { %1553 = vperm.xlu1 %1796, %v1954_v0   ;;  %1963 = vrcp.f32 %v1546_v34  ;;  %v1956_v41 = vpop.eup %1955 }
 0x41c   :  { %v1958_v48 = vpop.eup %1957 }
 0x41d   :  { %1451 = vperm.xlu0 %1795, %v1958_v48   ;;  %1558 = vperm.xlu1 %1796, %v1956_v41   ;;  %v1960_v61 = vpop.eup %1959 }
 0x420   :  { %v1962_v20 = vpop.eup %1961 }
 0x421   :  { %1563 = vperm.xlu0 %1795, %v1962_v20   ;;  %1456 = vperm.xlu1 %1796, %v1960_v61  }
 0x423   :  { %v1964_v27 = vpop.eup %1963 }
 0x425   :  { %1583 = vperm.xlu0 %1795, %v1580_v57   ;;  %1568 = vperm.xlu1 %1796, %v1964_v27  }
 0x494   :  { %v1442_v52 = vpop.permute.xlu1 %1441 }
 0x495   :  { %v1459_v12 = vmul.f32 %v1442_v52, %v2914_v7  ;;  %v1460_v63 = vmul.f32 %v1442_v52, %v2917_v42  ;;  %v1447_v26 = vpop.permute.xlu0 %1446 }
 0x496   :  { %v1461_v53 = vmul.f32 %v1447_v26, %v2960_v36  ;;  %v1462_v28 = vmul.f32 %v1447_v26, %v2963_v30 }
 0x498   :  { %v1765_v59 = vpack.c.bf16 %v1462_v28, %v1460_v63  ;;  %v1767_v1 = vpack.c.bf16 %v1461_v53, %v1459_v12  ;;  %v1554_v9 = vpop.permute.xlu1 %1553 }
 0x499   :  { %v1571_v51 = vmul.f32 %v1554_v9, %v2936_v16  ;;  %v1572_v39 = vmul.f32 %v1554_v9, %v2939_v23 }
 0x49a   :  { %1766 = vmatprep.subr.bf16.mxu0 %v1765_v59 }
 0x49b   :  { %1768 = vmatpush1.bf16.msra.mxu0 %v1767_v1 }
 0x49c   :  { %v1559_v22 = vpop.permute.xlu1 %1558  ;;  %v1452_v21 = vpop.permute.xlu0 %1451 }
 0x49d   :  { %v1573_v7 = vmul.f32 %v1559_v22, %v2973_v62  ;;  %v1574_v42 = vmul.f32 %v1559_v22, %v2976_v6  ;;  %v1463_v30 = vmul.f32 %v1452_v21, %v3075_v33  ;;  %v1464_v37 = vmul.f32 %v1452_v21, %v3077_v40  ;;  %v1579_v40 = vld [vmem:[%s3310_s9] sm:$0xff]  ;;  %s2030_s9 = smov [#allocation5]  }
 0x49e   :  { %s1746_s15 = sshll.u32 %s2030_s9, 4  ;;  %s1747_s15 = int_to_ptr.vmem [resolvable:$true] %s1746_s15 }
 0x49f   :  { %v1773_v49 = vpack.c.bf16 %v1574_v42, %v1572_v39  ;;  %v1775_v3 = vpack.c.bf16 %v1573_v7, %v1571_v51  ;;  %s1991_s17 = scalar_lea.vmem %s1747_s15, 512  ;;  %p1996_p9 = scmp.lt.s32.totalorder %s1747_s15, %s1747_s15 }
 0x4a0   :  { %v1457_v36 = vpop.permute.xlu1 %1456  ;;  %v1564_v44 = vpop.permute.xlu0 %1563  ;;  %p1992_p8 = scmp.ne.s32.totalorder %s1747_s15, %s1991_s17  ;;  %p1997_p10 = scmp.lt.s32.totalorder %s1991_s17, %s1991_s17 }
 0x4a1   :  { %v1465_v60 = vmul.f32 %v1457_v36, %v3187_v47  ;;  %v1466_v24 = vmul.f32 %v1457_v36, %v3189_v4  ;;  %1774 = vmatprep.subr.bf16.mxu1 %v1773_v49  ;;  %v1575_v62 = vmul.f32 %v1564_v44, %v3088_v58  ;;  %v1576_v6 = vmul.f32 %v1564_v44, %v3098_v55 }
 0x4a2   :  { %1776 = vmatpush1.bf16.msra.mxu1 %v1775_v3  ;;  %p1998_p11 = por %p1997_p10, %p1996_p9 }
 0x4a3   :  { %v1769_v16 = vpack.c.bf16 %v1466_v24, %v1464_v37  ;;  %v1771_v23 = vpack.c.bf16 %v1465_v60, %v1463_v30 }
 0x4a4   :  { %v1569_v2 = vpop.permute.xlu1 %1568  ;;  %v1584_v58 = vpop.permute.xlu0 %1583  ;;  %p1999_p12 = pnand %p1998_p11, %p1992_p8 }
 0x4a5   :  { %v1577_v25 = vmul.f32 %v1569_v2, %v3193_v10  ;;  %v1578_v33 = vmul.f32 %v1569_v2, %v3195_v31  ;;  %1770 = vmatprep.subr.bf16.mxu0 %v1769_v16  ;;  %v1965_v31 = vld [vmem:[%s3301_s0] sm:$0xff] }
 0x4a6   :  { %1772 = vmatpush1.bf16.msra.mxu0 %v1771_v23 }
 0x4a7   :  { %v1777_v47 = vpack.c.bf16 %v1578_v33, %v1576_v6  ;;  %v1779_v4 = vpack.c.bf16 %v1577_v25, %v1575_v62 }
 0x4a9   :  { %1763 = vmatmul.mubr.msk.f32.vlgmr.msra.gmra.mrb[8].mxu0 %vm1586_vm9, %v1579_v40  ;;  %1778 = vmatprep.subr.bf16.mxu1 %v1777_v47 }
 0x4aa   :  { %1780 = vmatpush1.bf16.msra.mxu1 %v1779_v4 }
 0x4ad   :  { %1764 = vmatmul.mubr.msk.f32.vlgmr.msra.gmra.mrb[8].mxu1 %vm1586_vm9, %v1579_v40 }
 0x57c   :  { %v1656_v14 = vpop.f32.mrb[8].mxu0 }
 0x57d   :  { %v1657_v55 = vadd.f32 %v1656_v14, %v1584_v58  ;;  %v1658_v13 = vpop.f32.mrb[9].mxu0 }
 0x57e   :  { %v1659_v10 = vadd.f32 %v1658_v13, %v1584_v58 }
 0x57f   :  { %v1732_v32 = vadd.f32 %v1965_v31, %v1657_v55 }
 0x580   :  { %v1733_v18 = vadd.f32 %v1966_v5, %v1659_v10  ;;  %v1727_v35 = vpop.f32.mrb[8].mxu1 }
 0x581   :  { %1736 = vst [vmem:[#allocation5] sm:$0xff] %v1732_v32  ;;  %v1728_v45 = vadd.f32 %v1727_v35, %v1584_v58  ;;  %v1729_v29 = vpop.f32.mrb[9].mxu1 }
 0x582   :  { %1737 = vst [vmem:[#allocation5 + $0x8] sm:$0xff] %v1733_v18  ;;  %v1730_v56 = vadd.f32 %v1729_v29, %v1584_v58 }
 0x583   :  { %v1734_v46 = vadd.f32 %v1967_v15, %v1728_v45 }
 0x584   :  { %v1735_v38 = vadd.f32 %v1968_v19, %v1730_v56 }
 0x585   :  { %1738 = vst [vmem:[#allocation5 + $0x10] sm:$0xff] %v1734_v46 }
 0x586   :  { %1739 = vst [vmem:[#allocation5 + $0x18] sm:$0xff] %v1735_v38 }
 0x587   :  { %2002 = shalt.err (!%p1999_p12)
}
 0x588   :  { %s2003_s19 = scalar_lea.hbm %s3312_s11, 512 }
 0x589   :  { %p2004_p13 = scmp.ne.s32.totalorder %s3312_s11, %s2003_s19  ;;  %p2007_p0 = scmp.lt.u32.totalorder %s2003_s19, %s3312_s11 }
 0x58b   :  { %p2009_p1 = pnand %p2007_p0, %p2004_p13 }
 0x58d   :  { %2012 = shalt.err (!%p2009_p1)
}
 0x58e   :  { %1749 = dma.vmem_to_hbm [thread:$0]  %s1747_s15, 512, %s3312_s11, [#allocation4]  }
 0x58f   :  { %2015 = dma.done.wait [#allocation4], 512  }
 0x590   :  { %2016 = vsyncadd [#allocation4], 4294966784 }
 0x591   :  { %1753 = vsyncpa [#allocation3], 1 }
 0x592   :  { %1754 = vsyncpa [#allocation4], 1 }

</bundles_post_ra>
